<compile_context>
chip_gen: v5e
topology: v5e:2x2
jax: 0.10.0
libtpu: 0.0.40
codegen_flags: <defaults>
</compile_context>

<pallas_src>
import jax
import jax.numpy as jnp
from jax.experimental import pallas as pl
from jax.experimental.pallas import tpu as pltpu

# Synthetic model sizes (the original uses nb_movies from the MovieLens data).
NB_MOVIES = 256          # synthetic stand-in for nb_movies (multiple of 128 -> lane-dense)
BATCH = 256              # users processed per call
TM = 128                 # batch tile (rows per grid step) -- fills MXU M dim
HP = 128                 # padded hidden width (all hidden dims <= 128)

LAYER_DIMS = [NB_MOVIES, 25, 15, 10, 15, 25, NB_MOVIES]


def sae_kernel(x_ref, w1_ref, wmid_ref, w6_ref, b_ref, o_ref):
    """Fused 6-layer SAE forward on one (TM, NB_MOVIES) batch tile."""
    b = b_ref[...]  # (8, NB_MOVIES) f32; rows 0..5 hold the six zero-padded biases

    def sigmoid(z):
        # exp -> EUP, approx reciprocal -> EUP; keeps VPU slots free.
        return pl.reciprocal(1.0 + jnp.exp(-z), approx=True)

    # fc1: (TM, NB_MOVIES) @ (NB_MOVIES, HP)
    h = jnp.dot(x_ref[...].astype(jnp.bfloat16), w1_ref[...],
                preferred_element_type=jnp.float32)
    h = sigmoid(h + b[0, :HP])

    # fc2..fc5: (TM, HP) @ (HP, HP), weights stacked in one (4, HP, HP) input
    for k in range(4):
        h = jnp.dot(h.astype(jnp.bfloat16), wmid_ref[k],
                    preferred_element_type=jnp.float32)
        h = sigmoid(h + b[k + 1, :HP])

    # fc6: (TM, HP) @ (HP, NB_MOVIES), no activation
    h = jnp.dot(h.astype(jnp.bfloat16), w6_ref[...],
                preferred_element_type=jnp.float32)
    o_ref[...] = (h + b[5, :NB_MOVIES]).astype(o_ref.dtype)


def init_params(key):
    """PyTorch-style nn.Linear init: U(-1/sqrt(fan_in), 1/sqrt(fan_in)).

    Weights are stored pre-transposed as (in, out) so the kernel computes
    x @ W + b (equivalent to PyTorch's x @ W.T + b).
    """
    params = []
    for i in range(6):
        fan_in, fan_out = LAYER_DIMS[i], LAYER_DIMS[i + 1]
        key, kw, kb = jax.random.split(key, 3)
        bound = 1.0 / (fan_in ** 0.5)
        w = jax.random.uniform(kw, (fan_in, fan_out), jnp.float32, -bound, bound)
        b = jax.random.uniform(kb, (fan_out,), jnp.float32, -bound, bound)
        params.append((w, b))
    return params


def pack_params(params):
    """Zero-pad hidden dims to 128 lanes, pack into 4 arrays, cast weights to bf16."""
    w1 = jnp.zeros((NB_MOVIES, HP), jnp.float32)
    w1 = w1.at[:, :LAYER_DIMS[1]].set(params[0][0])

    wmid = jnp.zeros((4, HP, HP), jnp.float32)
    for k in range(4):
        w, _ = params[k + 1]
        wmid = wmid.at[k, :w.shape[0], :w.shape[1]].set(w)

    w6 = jnp.zeros((HP, NB_MOVIES), jnp.float32)
    w6 = w6.at[:LAYER_DIMS[5], :].set(params[5][0])

    b_all = jnp.zeros((8, NB_MOVIES), jnp.float32)
    for i in range(6):
        b = params[i][1]
        b_all = b_all.at[i, :b.shape[0]].set(b)

    return (w1.astype(jnp.bfloat16),
            wmid.astype(jnp.bfloat16),
            w6.astype(jnp.bfloat16),
            b_all)


@jax.jit
def sae_forward(x, w1, wmid, w6, b_all):
    B = x.shape[0]
    Bp = pl.cdiv(B, TM) * TM
    if Bp != B:
        x = jnp.pad(x, ((0, Bp - B), (0, 0)))

    out = pl.pallas_call(
        sae_kernel,
        out_shape=jax.ShapeDtypeStruct((Bp, NB_MOVIES), jnp.float32),
        grid=(Bp // TM,),
        in_specs=[
            pl.BlockSpec((TM, NB_MOVIES), lambda i: (i, 0)),      # x: tiled over batch
            pl.BlockSpec((NB_MOVIES, HP), lambda i: (0, 0)),      # w1: VMEM-resident
            pl.BlockSpec((4, HP, HP), lambda i: (0, 0, 0)),       # w2..w5 stacked
            pl.BlockSpec((HP, NB_MOVIES), lambda i: (0, 0)),      # w6
            pl.BlockSpec((8, NB_MOVIES), lambda i: (0, 0)),       # all biases
        ],
        out_specs=pl.BlockSpec((TM, NB_MOVIES), lambda i: (i, 0)),
        compiler_params=pltpu.CompilerParams(
            dimension_semantics=("parallel",)),
    )(x, w1, wmid, w6, b_all)
    return out[:B]


def sae_reference(x, params):
    """Pure-JAX reference. Uses bf16-rounded weights (matching the kernel's MXU
    inputs) but full f32 activations and exact sigmoid."""
    h = x
    for i, (w, b) in enumerate(params):
        w_q = w.astype(jnp.bfloat16).astype(jnp.float32)
        h = h @ w_q + b
        if i < 5:
            h = jax.nn.sigmoid(h)
    return h


if __name__ == "__main__":
    key = jax.random.PRNGKey(0)
    key, kx = jax.random.split(key)

    # Synthetic "ratings" input: (batch, nb_movies), mostly zeros like the real
    # MovieLens data; surviving values are integers 4/5 (exact in bf16).
    x = jax.random.uniform(kx, (BATCH, NB_MOVIES), jnp.float32, 0.0, 5.0)
    x = jnp.where(x > 4.0, jnp.round(x), 0.0)

    params = init_params(key)
    w1, wmid, w6, b_all = pack_params(params)

    out = sae_forward(x, w1, wmid, w6, b_all)
    out = jax.block_until_ready(out)

    ref = sae_reference(x, params)
    assert out.shape == (BATCH, NB_MOVIES)
    # bf16 activations inside the kernel + approx reciprocal => loosened tolerance
    assert jnp.allclose(out, ref, atol=3e-2, rtol=3e-2), (
        "mismatch vs JAX reference: max abs diff = "
        f"{float(jnp.max(jnp.abs(out - ref)))}")

    print("KERNEL_OK")
</pallas_src>

<mosaic_0001>
module attributes {stable_mosaic.version = 11 : i64} {
  func.func @sae_kernel(%arg0: i32, %arg1: memref<128x256xf32, #tpu.memory_space<vmem>>, %arg2: memref<256x128xbf16, #tpu.memory_space<vmem>>, %arg3: memref<4x128x128xbf16, #tpu.memory_space<vmem>>, %arg4: memref<128x256xbf16, #tpu.memory_space<vmem>>, %arg5: memref<8x256xf32, #tpu.memory_space<vmem>>, %arg6: memref<128x256xf32, #tpu.memory_space<vmem>>) attributes {dimension_semantics = [#tpu.dimension_semantics<parallel>], iteration_bounds = array<i64: 2>, scalar_prefetch = 0 : i64, scratch_operands = 0 : i64, tpu.core_type = #tpu.core_type<tc>, window_params = [{transform_indices = @transform_0, window_bounds = array<i64: 128, 256>}, {pipeline_mode = #tpu.pipeline_mode<synchronous>, transform_indices = @transform_1, window_bounds = array<i64: 256, 128>}, {pipeline_mode = #tpu.pipeline_mode<synchronous>, transform_indices = @transform_2, window_bounds = array<i64: 4, 128, 128>}, {pipeline_mode = #tpu.pipeline_mode<synchronous>, transform_indices = @transform_3, window_bounds = array<i64: 128, 256>}, {pipeline_mode = #tpu.pipeline_mode<synchronous>, transform_indices = @transform_4, window_bounds = array<i64: 8, 256>}, {transform_indices = @transform_5, window_bounds = array<i64: 128, 256>}]} {
    %c0 = arith.constant 0 : index
    %c0_0 = arith.constant 0 : index
    %0 = vector.load %arg5[%c0, %c0_0] : memref<8x256xf32, #tpu.memory_space<vmem>>, vector<8x256xf32>
    %c0_1 = arith.constant 0 : index
    %c0_2 = arith.constant 0 : index
    %1 = vector.load %arg1[%c0_1, %c0_2] : memref<128x256xf32, #tpu.memory_space<vmem>>, vector<128x256xf32>
    %2 = arith.truncf %1 : vector<128x256xf32> to vector<128x256xbf16>
    %c0_3 = arith.constant 0 : index
    %c0_4 = arith.constant 0 : index
    %3 = vector.load %arg2[%c0_3, %c0_4] : memref<256x128xbf16, #tpu.memory_space<vmem>>, vector<256x128xbf16>
    %cst = arith.constant dense<0.000000e+00> : vector<128x128xf32>
    %4 = tpu.matmul %2, %3, %cst {dimension_numbers = #tpu.dot_dimension_numbers<[1], [0], [0], [1], [0, 0, 1, 1], [], []>} : vector<128x256xbf16>, vector<256x128xbf16>, vector<128x128xf32> -> vector<128x128xf32>
    %5 = vector.extract_strided_slice %0 {offsets = [0, 0], sizes = [1, 128], strides = [1, 1]} : vector<8x256xf32> to vector<1x128xf32>
    %6 = vector.shape_cast %5 : vector<1x128xf32> to vector<128xf32>
    %7 = vector.shape_cast %6 : vector<128xf32> to vector<1x128xf32>
    %8 = vector.broadcast %7 : vector<1x128xf32> to vector<128x128xf32>
    %9 = arith.addf %4, %8 : vector<128x128xf32>
    %cst_5 = arith.constant 0.000000e+00 : f32
    %10 = vector.broadcast %cst_5 : f32 to vector<128x128xf32>
    %11 = arith.subf %10, %9 : vector<128x128xf32>
    %12 = math.exp %11 : vector<128x128xf32>
    %cst_6 = arith.constant 1.000000e+00 : f32
    %13 = vector.broadcast %cst_6 : f32 to vector<128x128xf32>
    %14 = arith.addf %13, %12 : vector<128x128xf32>
    %15 = tpu.reciprocal %14 {approx = true} : vector<128x128xf32> -> vector<128x128xf32>
    %16 = arith.truncf %15 : vector<128x128xf32> to vector<128x128xbf16>
    %c0_7 = arith.constant 0 : index
    %c0_8 = arith.constant 0 : index
    %c0_9 = arith.constant 0 : index
    %17 = vector.load %arg3[%c0_7, %c0_8, %c0_9] : memref<4x128x128xbf16, #tpu.memory_space<vmem>>, vector<1x128x128xbf16>
    %18 = vector.shape_cast %17 : vector<1x128x128xbf16> to vector<128x128xbf16>
    %cst_10 = arith.constant dense<0.000000e+00> : vector<128x128xf32>
    %19 = tpu.matmul %16, %18, %cst_10 {dimension_numbers = #tpu.dot_dimension_numbers<[1], [0], [0], [1], [0, 0, 1, 1], [], []>} : vector<128x128xbf16>, vector<128x128xbf16>, vector<128x128xf32> -> vector<128x128xf32>
    %20 = vector.extract_strided_slice %0 {offsets = [1, 0], sizes = [1, 128], strides = [1, 1]} : vector<8x256xf32> to vector<1x128xf32>
    %21 = vector.shape_cast %20 : vector<1x128xf32> to vector<128xf32>
    %22 = vector.shape_cast %21 : vector<128xf32> to vector<1x128xf32>
    %23 = vector.broadcast %22 : vector<1x128xf32> to vector<128x128xf32>
    %24 = arith.addf %19, %23 : vector<128x128xf32>
    %cst_11 = arith.constant 0.000000e+00 : f32
    %25 = vector.broadcast %cst_11 : f32 to vector<128x128xf32>
    %26 = arith.subf %25, %24 : vector<128x128xf32>
    %27 = math.exp %26 : vector<128x128xf32>
    %cst_12 = arith.constant 1.000000e+00 : f32
    %28 = vector.broadcast %cst_12 : f32 to vector<128x128xf32>
    %29 = arith.addf %28, %27 : vector<128x128xf32>
    %30 = tpu.reciprocal %29 {approx = true} : vector<128x128xf32> -> vector<128x128xf32>
    %31 = arith.truncf %30 : vector<128x128xf32> to vector<128x128xbf16>
    %c1 = arith.constant 1 : index
    %c0_13 = arith.constant 0 : index
    %c0_14 = arith.constant 0 : index
    %32 = vector.load %arg3[%c1, %c0_13, %c0_14] : memref<4x128x128xbf16, #tpu.memory_space<vmem>>, vector<1x128x128xbf16>
    %33 = vector.shape_cast %32 : vector<1x128x128xbf16> to vector<128x128xbf16>
    %cst_15 = arith.constant dense<0.000000e+00> : vector<128x128xf32>
    %34 = tpu.matmul %31, %33, %cst_15 {dimension_numbers = #tpu.dot_dimension_numbers<[1], [0], [0], [1], [0, 0, 1, 1], [], []>} : vector<128x128xbf16>, vector<128x128xbf16>, vector<128x128xf32> -> vector<128x128xf32>
    %35 = vector.extract_strided_slice %0 {offsets = [2, 0], sizes = [1, 128], strides = [1, 1]} : vector<8x256xf32> to vector<1x128xf32>
    %36 = vector.shape_cast %35 : vector<1x128xf32> to vector<128xf32>
    %37 = vector.shape_cast %36 : vector<128xf32> to vector<1x128xf32>
    %38 = vector.broadcast %37 : vector<1x128xf32> to vector<128x128xf32>
    %39 = arith.addf %34, %38 : vector<128x128xf32>
    %cst_16 = arith.constant 0.000000e+00 : f32
    %40 = vector.broadcast %cst_16 : f32 to vector<128x128xf32>
    %41 = arith.subf %40, %39 : vector<128x128xf32>
    %42 = math.exp %41 : vector<128x128xf32>
    %cst_17 = arith.constant 1.000000e+00 : f32
    %43 = vector.broadcast %cst_17 : f32 to vector<128x128xf32>
    %44 = arith.addf %43, %42 : vector<128x128xf32>
    %45 = tpu.reciprocal %44 {approx = true} : vector<128x128xf32> -> vector<128x128xf32>
    %46 = arith.truncf %45 : vector<128x128xf32> to vector<128x128xbf16>
    %c2 = arith.constant 2 : index
    %c0_18 = arith.constant 0 : index
    %c0_19 = arith.constant 0 : index
    %47 = vector.load %arg3[%c2, %c0_18, %c0_19] : memref<4x128x128xbf16, #tpu.memory_space<vmem>>, vector<1x128x128xbf16>
    %48 = vector.shape_cast %47 : vector<1x128x128xbf16> to vector<128x128xbf16>
    %cst_20 = arith.constant dense<0.000000e+00> : vector<128x128xf32>
    %49 = tpu.matmul %46, %48, %cst_20 {dimension_numbers = #tpu.dot_dimension_numbers<[1], [0], [0], [1], [0, 0, 1, 1], [], []>} : vector<128x128xbf16>, vector<128x128xbf16>, vector<128x128xf32> -> vector<128x128xf32>
    %50 = vector.extract_strided_slice %0 {offsets = [3, 0], sizes = [1, 128], strides = [1, 1]} : vector<8x256xf32> to vector<1x128xf32>
    %51 = vector.shape_cast %50 : vector<1x128xf32> to vector<128xf32>
    %52 = vector.shape_cast %51 : vector<128xf32> to vector<1x128xf32>
    %53 = vector.broadcast %52 : vector<1x128xf32> to vector<128x128xf32>
    %54 = arith.addf %49, %53 : vector<128x128xf32>
    %cst_21 = arith.constant 0.000000e+00 : f32
    %55 = vector.broadcast %cst_21 : f32 to vector<128x128xf32>
    %56 = arith.subf %55, %54 : vector<128x128xf32>
    %57 = math.exp %56 : vector<128x128xf32>
    %cst_22 = arith.constant 1.000000e+00 : f32
    %58 = vector.broadcast %cst_22 : f32 to vector<128x128xf32>
    %59 = arith.addf %58, %57 : vector<128x128xf32>
    %60 = tpu.reciprocal %59 {approx = true} : vector<128x128xf32> -> vector<128x128xf32>
    %61 = arith.truncf %60 : vector<128x128xf32> to vector<128x128xbf16>
    %c3 = arith.constant 3 : index
    %c0_23 = arith.constant 0 : index
    %c0_24 = arith.constant 0 : index
    %62 = vector.load %arg3[%c3, %c0_23, %c0_24] : memref<4x128x128xbf16, #tpu.memory_space<vmem>>, vector<1x128x128xbf16>
    %63 = vector.shape_cast %62 : vector<1x128x128xbf16> to vector<128x128xbf16>
    %cst_25 = arith.constant dense<0.000000e+00> : vector<128x128xf32>
    %64 = tpu.matmul %61, %63, %cst_25 {dimension_numbers = #tpu.dot_dimension_numbers<[1], [0], [0], [1], [0, 0, 1, 1], [], []>} : vector<128x128xbf16>, vector<128x128xbf16>, vector<128x128xf32> -> vector<128x128xf32>
    %65 = vector.extract_strided_slice %0 {offsets = [4, 0], sizes = [1, 128], strides = [1, 1]} : vector<8x256xf32> to vector<1x128xf32>
    %66 = vector.shape_cast %65 : vector<1x128xf32> to vector<128xf32>
    %67 = vector.shape_cast %66 : vector<128xf32> to vector<1x128xf32>
    %68 = vector.broadcast %67 : vector<1x128xf32> to vector<128x128xf32>
    %69 = arith.addf %64, %68 : vector<128x128xf32>
    %cst_26 = arith.constant 0.000000e+00 : f32
    %70 = vector.broadcast %cst_26 : f32 to vector<128x128xf32>
    %71 = arith.subf %70, %69 : vector<128x128xf32>
    %72 = math.exp %71 : vector<128x128xf32>
    %cst_27 = arith.constant 1.000000e+00 : f32
    %73 = vector.broadcast %cst_27 : f32 to vector<128x128xf32>
    %74 = arith.addf %73, %72 : vector<128x128xf32>
    %75 = tpu.reciprocal %74 {approx = true} : vector<128x128xf32> -> vector<128x128xf32>
    %76 = arith.truncf %75 : vector<128x128xf32> to vector<128x128xbf16>
    %c0_28 = arith.constant 0 : index
    %c0_29 = arith.constant 0 : index
    %77 = vector.load %arg4[%c0_28, %c0_29] : memref<128x256xbf16, #tpu.memory_space<vmem>>, vector<128x256xbf16>
    %cst_30 = arith.constant dense<0.000000e+00> : vector<128x256xf32>
    %78 = tpu.matmul %76, %77, %cst_30 {dimension_numbers = #tpu.dot_dimension_numbers<[1], [0], [0], [1], [0, 0, 1, 1], [], []>} : vector<128x128xbf16>, vector<128x256xbf16>, vector<128x256xf32> -> vector<128x256xf32>
    %79 = vector.extract_strided_slice %0 {offsets = [5, 0], sizes = [1, 256], strides = [1, 1]} : vector<8x256xf32> to vector<1x256xf32>
    %80 = vector.shape_cast %79 : vector<1x256xf32> to vector<256xf32>
    %81 = vector.shape_cast %80 : vector<256xf32> to vector<1x256xf32>
    %82 = vector.broadcast %81 : vector<1x256xf32> to vector<128x256xf32>
    %83 = arith.addf %78, %82 : vector<128x256xf32>
    %c0_31 = arith.constant 0 : index
    %c0_32 = arith.constant 0 : index
    %84 = vector.load %arg6[%c0_31, %c0_32] : memref<128x256xf32, #tpu.memory_space<vmem>>, vector<128x256xf32>
    tpu.vector_store %arg6[%c0_31, %c0_32], %83 {strides = array<i32>} : memref<128x256xf32, #tpu.memory_space<vmem>>, vector<128x256xf32>,
    return
  }
  func.func @transform_0(%arg0: i32) -> (i32, i32) {
    %c0_i32 = arith.constant 0 : i32
    %c0_i32_0 = arith.constant 0 : i32
    return %arg0, %c0_i32 : i32, i32
  }
  func.func @transform_1(%arg0: i32) -> (i32, i32) {
    %c0_i32 = arith.constant 0 : i32
    %c0_i32_0 = arith.constant 0 : i32
    %c0_i32_1 = arith.constant 0 : i32
    return %c0_i32, %c0_i32_0 : i32, i32
  }
  func.func @transform_2(%arg0: i32) -> (i32, i32, i32) {
    %c0_i32 = arith.constant 0 : i32
    %c0_i32_0 = arith.constant 0 : i32
    %c0_i32_1 = arith.constant 0 : i32
    %c0_i32_2 = arith.constant 0 : i32
    return %c0_i32, %c0_i32_0, %c0_i32_1 : i32, i32, i32
  }
  func.func @transform_3(%arg0: i32) -> (i32, i32) {
    %c0_i32 = arith.constant 0 : i32
    %c0_i32_0 = arith.constant 0 : i32
    %c0_i32_1 = arith.constant 0 : i32
    return %c0_i32, %c0_i32_0 : i32, i32
  }
  func.func @transform_4(%arg0: i32) -> (i32, i32) {
    %c0_i32 = arith.constant 0 : i32
    %c0_i32_0 = arith.constant 0 : i32
    %c0_i32_1 = arith.constant 0 : i32
    return %c0_i32, %c0_i32_0 : i32, i32
  }
  func.func @transform_5(%arg0: i32) -> (i32, i32) {
    %c0_i32 = arith.constant 0 : i32
    %c0_i32_0 = arith.constant 0 : i32
    return %arg0, %c0_i32 : i32, i32
  }
}

</mosaic_0001>

<bundles_post_ra>
// kernel: sae_forward.1
= control target key start
LH: loop header
LB: loop body
LE: loop exit
PB: predicated region body
PF: predicated region fallthrough
CT: control target
= control target key end

     0   :  { %10 = vsyncpa [#allocation3], 0  ;;  %s3248_s0 = inlined_call_operand.hbm [shape: f32[256,256], index: 0, kind: input, shape index: {}]   ;;  %s3249_s1 = inlined_call_operand.hbm [shape: bf16[256,128], index: 1, kind: input, shape index: {}]   ;;  %s3250_s2 = inlined_call_operand.hbm [shape: bf16[4,128,128], index: 2, kind: input, shape index: {}]   ;;  %s3251_s3 = inlined_call_operand.hbm [shape: bf16[128,256], index: 3, kind: input, shape index: {}]   ;;  %s3252_s4 = inlined_call_operand.hbm [shape: f32[8,256], index: 4, kind: input, shape index: {}]   ;;  %s3253_s5 = inlined_call_operand.hbm [shape: f32[256,256], index: 5, kind: output, shape index: {}]  }
   0x1   :  { %12 = vsyncpa [#allocation3 + $0x1], 0 }
   0x2   :  { %13 = vsyncpa [#allocation6], 0 }
   0x3   :  { %14 = vsyncpa [#allocation9], 0 }
   0x4   :  { %15 = vsyncpa [#allocation4], 0 }
   0x5   :  { %17 = vsyncpa [#allocation4 + $0x1], 0  ;;  %s2876_s18 = smov 0   ;;  %s2878_s19 = smov 0  }
   0x6   :  { %s2880_s20 = smov 0   ;;  %s2882_s21 = smov 0  }
   0x7 LB: > { %s2897_s22 = sadd.s32 4294967295, %s2832_s21   ;;  %s1844_s23 = sadd.s32 4294967294, %s2832_s21   ;;  %s2832_s21 = sphi %s2882_s21, %s3264_s21   ;;  %s2828_s20 = sphi %s2880_s20, %s3263_s20   ;;  %s2824_s19 = sphi %s2878_s19, %s3262_s19   ;;  %s2820_s18 = sphi %s2876_s18, %s3261_s18  }
   0x8   : > { %p43_p0 = scmp.ne.s32.totalorder %s2824_s19, %s2820_s18  ;;  %p44_p1 = scmp.eq.s32.totalorder %s2897_s22, 0 }
   0x9   : > { %p151_p2 = scmp.eq.s32.totalorder %s2897_s22, 1  ;;  %p157_p3 = scmp.eq.s32.totalorder %s1844_s23, 1 }
   0xa   : > { %p2906_p4 = por %p44_p1, %p43_p0  ;;  %p1845_p5 = scmp.ge.s32.totalorder %s2832_s21, 1 }
   0xb   : > { %p2911_p6 = por %p157_p3, %p43_p0  ;;  %p164_p7 = scmp.lt.s32.totalorder %s2832_s21, 3 }
   0xc   : > { %s175_s28 = sshll.u32 %s3249_s1, 4  ;;  %s2834_s30 = smov [#allocation5]   ;;  %s176_s28 = int_to_ptr.hbm [resolvable:$true] %s175_s28 }
   0xd   : > { %p2919_p8 = pnand %p1845_p5, %p164_p7  ;;  %s177_s6 = sshll.u32 %s2834_s30, 4  ;;  %s178_s6 = int_to_ptr.vmem [resolvable:$true] %s177_s6 }
   0xe   : > { %s203_s10 = sshll.u32 %s3251_s3, 4  ;;  %s2835_s11 = smov 64   ;;  %s204_s10 = int_to_ptr.hbm [resolvable:$true] %s203_s10 }
   0xf   : > { %p2212_p9 = pneg %p2919_p8  ;;  %s2836_s12 = smov 4  }
  0x10   : > { %s2837_s13 = smov [#allocation8]   ;;  %s2838_s15 = smov 128  }
  0x11   : > { %p2927_p10 = pnand %p2212_p9, %p44_p1  ;;  %s205_s14 = sshll.u32 %s2837_s13, 4  ;;  %s206_s14 = int_to_ptr.vmem [resolvable:$true] %s205_s14 }
  0x12   : > { %s2839_s16 = smov 8   ;;  %s189_s26 = sshll.u32 %s3250_s2, 4  ;;  %s190_s26 = int_to_ptr.hbm [resolvable:$true] %s189_s26 }
  0x13   : > { %2215 = dma.hbm_to_vmem [thread:$0]  (!%p2927_p10), %s176_s28, 2048, %s178_s6, [#allocation6], %s2835_s11, %s2835_s11, %s2836_s12  }
  0x14   : > { %2221 = dma.hbm_to_vmem [thread:$0]  (!%p2927_p10), %s204_s10, 2048, %s206_s14, [#allocation9], %s2838_s15, %s2838_s15, %s2839_s16  }
  0x15   : > { %s2840_s27 = smov [#allocation7]   ;;  %s218_s8 = sshll.u32 %s3252_s4, 4  ;;  %s219_s8 = int_to_ptr.hbm [resolvable:$true] %s218_s8 }
  0x16   : > { %s191_s28 = sshll.u32 %s2840_s27, 4  ;;  %s2841_s9 = smov [#allocation10]   ;;  %s192_s28 = int_to_ptr.vmem [resolvable:$true] %s191_s28 }
  0x17   : > { %2218 = dma.hbm_to_vmem [thread:$0]  (!%p2927_p10), %s190_s26, 4096, %s192_s28, [#allocation6], %s2835_s11, %s2835_s11, %s2836_s12  }
  0x18   : > { %s220_s10 = sshll.u32 %s2841_s9, 4  ;;  %s2950_s13 = sadd.s32 1, %s2832_s21   ;;  %s221_s10 = int_to_ptr.vmem [resolvable:$true] %s220_s10 }
  0x19   : > { %2224 = dma.hbm_to_vmem [thread:$0]  (!%p2927_p10), %s219_s8, 256, %s221_s10, [#allocation9]  }
  0x1a   : > { %s30_s14 = sadd.s32 1, %s2828_s20  ;;  %s27_s15 = ssub.s32 %s2832_s21, %s2950_s13 }
  0x1b   : > { %p37_p12 = scmp.ne.s32.totalorder %s2828_s20, %s2824_s19  ;;  %p28_p13 = scmp.eq.s32.totalorder %s27_s15, 0 }
  0x1c   : > { %p38_p0 = scmp.eq.s32.totalorder %s2832_s21, 0  ;;  %p2237_p5 = scmp.lt.s32.totalorder %s2832_s21, 2 }
  0x1d   : > { %p2960_p3 = por %p151_p2, %p37_p12  ;;  %s231_s12 = sand.u32 1, %s2828_s20  }
  0x1e   : > { %s2966_s11 = scalar_select %p28_p13, %s2828_s20, %s30_s14  }
  0x1f   : > { %p39_p7 = por %p38_p0, %p37_p12  ;;  %s1851_s7 = sshll.u32 %s231_s12, 8 }
  0x20   : > { %s2125_s17 = sshll.u32 %s2832_s21, 8  ;;  %s235_s28 = scalar_lea.vmem [#allocation2], %s1851_s7 }
  0x21   : > { %s241_s27 = scalar_lea.hbm %s3248_s0, %s2125_s17  ;;  %s244_s30 = sshll.u32 %s235_s28, 4  ;;  %s245_s30 = int_to_ptr.vmem [resolvable:$true] %s244_s30 }
  0x22   : > { %s242_s6 = sshll.u32 %s241_s27, 4  ;;  %p2973_p2 = pnand %p2237_p5, %p39_p7  ;;  %s243_s6 = int_to_ptr.hbm [resolvable:$true] %s242_s6 }
  0x23   : > { %s232_s9 = scalar_lea.sflag [#allocation3], %s231_s12  ;;  %s2728_s10 = sshra.s32 %s243_s6, 4  ;;  %s2729_s10 = int_to_ptr.hbm [resolvable:$true] %s2728_s10 }
  0x24   : > { %s2730_s14 = scalar_lea.hbm %s2729_s10, 256  ;;  %p2732_p10 = pneg %p2973_p2 }
  0x25   : > { %p2731_p9 = scmp.ne.s32.totalorder %s2729_s10, %s2730_s14  ;;  %s2735_s17 = scalar_lea.hbm %s3248_s0, 512 }
  0x26   : > { %p2736_p0 = scmp.lt.s32.totalorder %s2729_s10, %s3248_s0  ;;  %p2737_p5 = scmp.lt.s32.totalorder %s2735_s17, %s2730_s14 }
  0x27   : > { %p2733_p12 = pnand %p2732_p10, %p2731_p9 }
  0x28   : > { %p2738_p7 = por %p2737_p5, %p2736_p0 }
  0x29   : > { %p2734_p13 = pneg %p2733_p12 }
  0x2b   : > { %p2739_p11 = pnand %p2738_p7, %p2734_p13 }
  0x2d   : > { %2742 = shalt.err (!%p2739_p11)
}
  0x2e   : > { %s2842_s12 = smov 256   ;;  %s2843_s27 = smov 16  }
  0x2f   : > { %2228 = dma.hbm_to_vmem [thread:$0]  (!%p2973_p2), %s243_s6, 4096, %s245_s30, %s232_s9, %s2842_s12, %s2842_s12, %s2843_s27  }
  0x30   : > { %256 = sbr.rel (%p2919_p8) target bundleno = 1153 (0x481), region = 40  ;;  %s2990_s28 = sand.u32 (!%p2919_p8), 1, %s2824_s19  }
  0x31   : > { %s1856_s10 = sshll.u32 (!%p2919_p8), %s2990_s28, 8  ;;  %s259_s14 = scalar_lea.sflag (!%p2919_p8), [#allocation3], %s2990_s28 }
  0x32   : > { %s2996_s15 = scalar_lea.vmem (!%p2919_p8), [#allocation2], %s1856_s10 }
  0x35   : > { %2803 = dma.done.wait (%p2906_p4), %s259_s14, 4096  }
  0x36   : > { %2805 = vsyncadd (%p2906_p4), %s259_s14, 4294963200 }
  0x37   : > { %2807 = dma.done.wait (%p44_p1), [#allocation6], 6144  }
  0x38   : > { %2809 = vsyncadd (%p44_p1), [#allocation6], 4294961152 }
  0x39   : > { %2811 = dma.done.wait (%p44_p1), [#allocation9], 2304  }
  0x3a   : > { %2813 = vsyncadd (%p44_p1), [#allocation9], 4294964992  ;;  %v2133_v0 = vld [vmem:[#allocation5 + $0x38] sm:$0xff]  ;;  %v2132_v2 = vld [vmem:[#allocation5 + $0x30] sm:$0xff]  ;;  %s3150_s24 = scalar_lea.vmem [#allocation11], %s1856_s10  ;;  %s2191_s29 = sshll.u32 %s2897_s22, 8 }
  0x3b   : > { %v2141_v1 = vld [vmem:[#allocation5 + $0x78] sm:$0xff]  ;;  %491 = vmatpush.bf16.msra.mxu0 %v2133_v0  ;;  %v2140_v3 = vld [vmem:[#allocation5 + $0x70] sm:$0xff]  ;;  %v2131_v4 = vld [vmem:[#allocation5 + $0x28] sm:$0xff]  ;;  %s1729_s8 = scalar_lea.hbm %s3253_s5, %s2191_s29  ;;  %s1730_s9 = sshll.u32 %s3150_s24, 4  ;;  %s1731_s9 = int_to_ptr.vmem [resolvable:$true] %s1730_s9 }
  0x3c   : > { %540 = vmatpush.bf16.msra.mxu1 %v2141_v1  ;;  %v2139_v5 = vld [vmem:[#allocation5 + $0x68] sm:$0xff]  ;;  %v2130_v6 = vld [vmem:[#allocation5 + $0x20] sm:$0xff]  ;;  %v2129_v8 = vld [vmem:[#allocation5 + $0x18] sm:$0xff]  ;;  %s1732_s7 = sshll.u32 %s1729_s8, 4  ;;  %s1717_s22 = scalar_lea.sflag [#allocation4], %s2990_s28  ;;  %s1733_s7 = int_to_ptr.hbm [resolvable:$true] %s1732_s7 }
  0x3d   : > { %v2138_v7 = vld [vmem:[#allocation5 + $0x60] sm:$0xff]  ;;  %v2137_v9 = vld [vmem:[#allocation5 + $0x58] sm:$0xff]  ;;  %v2128_v10 = vld [vmem:[#allocation5 + $0x10] sm:$0xff]  ;;  %s2772_s17 = sshra.s32 %s1733_s7, 4  ;;  %s2778_s27 = scalar_lea.hbm %s3253_s5, 512  ;;  %s2773_s17 = int_to_ptr.hbm [resolvable:$true] %s2772_s17 }
  0x3e   : > { %v2136_v11 = vld [vmem:[#allocation5 + $0x50] sm:$0xff]  ;;  %v2127_v12 = vld [vmem:[#allocation5 + $0x8] sm:$0xff]  ;;  %v2126_v14 = vld [vmem:[#allocation5] sm:$0xff]  ;;  %s2774_s23 = scalar_lea.hbm %s2773_s17, 256  ;;  %p2779_p11 = scmp.lt.s32.totalorder %s2773_s17, %s3253_s5 }
  0x3f   : > { %492 = vmatpush.bf16.msra.mxu0 %v2132_v2  ;;  %v2135_v13 = vld [vmem:[#allocation5 + $0x48] sm:$0xff]  ;;  %v2134_v15 = vld [vmem:[#allocation5 + $0x40] sm:$0xff]  ;;  %v316_v17 = vld [vmem:[%s2996_s15 + $0x10] sm:$0xff]  ;;  %p2775_p1 = scmp.ne.s32.totalorder %s2773_s17, %s2774_s23  ;;  %p2780_p2 = scmp.lt.s32.totalorder %s2778_s27, %s2774_s23 }
  0x40   : > { %541 = vmatpush.bf16.msra.mxu1 %v2140_v3  ;;  %v314_v16 = vld [vmem:[%s2996_s15] sm:$0xff]  ;;  %v315_v18 = vld [vmem:[%s2996_s15 + $0x8] sm:$0xff]  ;;  %v317_v19 = vld [vmem:[%s2996_s15 + $0x18] sm:$0xff] }
  0x41   : > { %v346_v20 = vpack.c.bf16 %v316_v17, %v314_v16  ;;  %v347_v21 = vpack.c.bf16 %v317_v19, %v315_v18  ;;  %v318_v22 = vld [vmem:[%s2996_s15 + $0x20] sm:$0xff]  ;;  %v320_v23 = vld [vmem:[%s2996_s15 + $0x30] sm:$0xff]  ;;  %v319_v24 = vld [vmem:[%s2996_s15 + $0x28] sm:$0xff]  ;;  %p2776_p4 = pnand %p2775_p1, %p2960_p3  ;;  %p2781_p9 = por %p2780_p2, %p2779_p11 }
  0x42   : > { %v321_v25 = vld [vmem:[%s2996_s15 + $0x38] sm:$0xff]  ;;  %v348_v26 = vpack.c.bf16 %v320_v23, %v318_v22  ;;  %v322_v28 = vld [vmem:[%s2996_s15 + $0x40] sm:$0xff]  ;;  %v324_v29 = vld [vmem:[%s2996_s15 + $0x50] sm:$0xff] }
  0x43   : > { %493 = vmatpush.bf16.msra.mxu0 %v2131_v4  ;;  %v349_v27 = vpack.c.bf16 %v321_v25, %v319_v24  ;;  %v323_v30 = vld [vmem:[%s2996_s15 + $0x48] sm:$0xff]  ;;  %v325_v31 = vld [vmem:[%s2996_s15 + $0x58] sm:$0xff]  ;;  %v350_v32 = vpack.c.bf16 %v324_v29, %v322_v28  ;;  %v326_v34 = vld [vmem:[%s2996_s15 + $0x60] sm:$0xff]  ;;  %p2777_p8 = pneg %p2776_p4 }
  0x44   : > { %542 = vmatpush.bf16.msra.mxu1 %v2139_v5  ;;  %v351_v33 = vpack.c.bf16 %v325_v31, %v323_v30  ;;  %v328_v35 = vld [vmem:[%s2996_s15 + $0x70] sm:$0xff]  ;;  %v327_v36 = vld [vmem:[%s2996_s15 + $0x68] sm:$0xff]  ;;  %v329_v37 = vld [vmem:[%s2996_s15 + $0x78] sm:$0xff] }
  0x45   : > { %v352_v38 = vpack.c.bf16 %v328_v35, %v326_v34  ;;  %v353_v39 = vpack.c.bf16 %v329_v37, %v327_v36  ;;  %v330_v40 = vld [vmem:[%s2996_s15 + $0x80] sm:$0xff]  ;;  %v332_v41 = vld [vmem:[%s2996_s15 + $0x90] sm:$0xff]  ;;  %v331_v42 = vld [vmem:[%s2996_s15 + $0x88] sm:$0xff]  ;;  %p2782_p10 = pnand %p2781_p9, %p2777_p8 }
  0x46   : > { %v333_v43 = vld [vmem:[%s2996_s15 + $0x98] sm:$0xff]  ;;  %v354_v44 = vpack.c.bf16 %v332_v41, %v330_v40  ;;  %v334_v46 = vld [vmem:[%s2996_s15 + $0xa0] sm:$0xff]  ;;  %v336_v47 = vld [vmem:[%s2996_s15 + $0xb0] sm:$0xff] }
  0x47   : > { %494 = vmatpush.bf16.msra.mxu0 %v2130_v6  ;;  %v355_v45 = vpack.c.bf16 %v333_v43, %v331_v42  ;;  %v335_v48 = vld [vmem:[%s2996_s15 + $0xa8] sm:$0xff]  ;;  %v337_v49 = vld [vmem:[%s2996_s15 + $0xb8] sm:$0xff]  ;;  %v356_v50 = vpack.c.bf16 %v336_v47, %v334_v46  ;;  %v338_v52 = vld [vmem:[%s2996_s15 + $0xc0] sm:$0xff] }
  0x48   : > { %543 = vmatpush.bf16.msra.mxu1 %v2138_v7  ;;  %v357_v51 = vpack.c.bf16 %v337_v49, %v335_v48  ;;  %v340_v53 = vld [vmem:[%s2996_s15 + $0xd0] sm:$0xff]  ;;  %v339_v54 = vld [vmem:[%s2996_s15 + $0xc8] sm:$0xff]  ;;  %v341_v55 = vld [vmem:[%s2996_s15 + $0xd8] sm:$0xff] }
  0x49   : > { %v358_v56 = vpack.c.bf16 %v340_v53, %v338_v52  ;;  %v359_v57 = vpack.c.bf16 %v341_v55, %v339_v54  ;;  %v2149_v58 = vld [vmem:[#allocation7 + $0x38] sm:$0xff]  ;;  %v2148_v59 = vld [vmem:[#allocation7 + $0x30] sm:$0xff]  ;;  %v2147_v60 = vld [vmem:[#allocation7 + $0x28] sm:$0xff] }
  0x4a   : > { %742 = vmatpush.bf16.msra.mxu2 %v2149_v58  ;;  %v342_v61 = vld [vmem:[%s2996_s15 + $0xe0] sm:$0xff]  ;;  %v344_v62 = vld [vmem:[%s2996_s15 + $0xf0] sm:$0xff]  ;;  %v343_v63 = vld [vmem:[%s2996_s15 + $0xe8] sm:$0xff] }
  0x4b   : > { %495 = vmatpush.bf16.msra.mxu0 %v2129_v8  ;;  %v345_v0 = vld [vmem:[%s2996_s15 + $0xf8] sm:$0xff]  ;;  %v2146_v1 = vld [vmem:[#allocation7 + $0x20] sm:$0xff]  ;;  %v360_v2 = vpack.c.bf16 %v344_v62, %v342_v61  ;;  %v2144_v5 = vld [vmem:[#allocation7 + $0x10] sm:$0xff] }
  0x4c   : > { %544 = vmatpush.bf16.msra.mxu1 %v2137_v9  ;;  %v361_v3 = vpack.c.bf16 %v345_v0, %v343_v63  ;;  %v2145_v4 = vld [vmem:[#allocation7 + $0x18] sm:$0xff]  ;;  %v3042_v6 = vld [vmem:[#allocation10] sm:$0xff]  ;;  %v2143_v7 = vld [vmem:[#allocation7 + $0x8] sm:$0xff] }
  0x4d   : > { %v3045_v8 = vperm.slane %v3042_v6, 0  ;;  %v2142_v9 = vld [vmem:[#allocation7] sm:$0xff] }
  0x4e   : > { %743 = vmatpush.bf16.msra.mxu2 %v2148_v59 }
  0x4f   : > { %496 = vmatpush.bf16.msra.mxu0 %v2128_v10 }
  0x50   : > { %545 = vmatpush.bf16.msra.mxu1 %v2136_v11 }
  0x52   : > { %744 = vmatpush.bf16.msra.mxu2 %v2147_v60 }
  0x53   : > { %497 = vmatpush.bf16.msra.mxu0 %v2127_v12 }
  0x54   : > { %546 = vmatpush.bf16.msra.mxu1 %v2135_v13 }
  0x56   : > { %745 = vmatpush.bf16.msra.mxu2 %v2146_v1 }
  0x57   : > { %498 = vmatpush.bf16.msra.mxu0 %v2126_v14 }
  0x58   : > { %547 = vmatpush.bf16.msra.mxu1 %v2134_v15 }
  0x5a   : > { %499 = vmatmul.bf16.vlgmr.msra.gmra.mxu0 %v346_v20  ;;  %746 = vmatpush.bf16.msra.mxu2 %v2145_v4 }
  0x5b   : > { %548 = vmatmul.bf16.vlgmr.msra.gmra.mxu1 %v347_v21 }
  0x5e   : > { %747 = vmatpush.bf16.msra.mxu2 %v2144_v5 }
  0x62   : > { %748 = vmatpush.bf16.msra.mxu2 %v2143_v7 }
  0x66   : > { %749 = vmatpush.bf16.msra.mxu2 %v2142_v9 }
  0x6a   : > { %504 = vmatmul.bf16.gmra.mxu0 %v348_v26 }
  0x6b   : > { %553 = vmatmul.bf16.gmra.mxu1 %v349_v27 }
  0x7a   : > { %509 = vmatmul.bf16.gmra.mxu0 %v350_v32 }
  0x7b   : > { %558 = vmatmul.bf16.gmra.mxu1 %v351_v33 }
  0x8a   : > { %514 = vmatmul.bf16.gmra.mxu0 %v352_v38 }
  0x8b   : > { %563 = vmatmul.bf16.gmra.mxu1 %v353_v39 }
  0x9a   : > { %519 = vmatmul.bf16.gmra.mxu0 %v354_v44 }
  0x9b   : > { %568 = vmatmul.bf16.gmra.mxu1 %v355_v45 }
  0xaa   : > { %524 = vmatmul.bf16.gmra.mxu0 %v356_v50 }
  0xab   : > { %573 = vmatmul.bf16.gmra.mxu1 %v357_v51 }
  0xba   : > { %529 = vmatmul.bf16.gmra.mxu0 %v358_v56 }
  0xbb   : > { %578 = vmatmul.bf16.gmra.mxu1 %v359_v57 }
  0xca   : > { %534 = vmatmul.bf16.gmra.mxu0 %v360_v2 }
  0xcb   : > { %583 = vmatmul.bf16.gmra.mxu1 %v361_v3 }
  0xd7   : > { %v500_v10 = vpop.f32.mrf.mxu0 }
  0xd8   : > { %v549_v11 = vpop.f32.mrf.mxu1  ;;  %v501_v12 = vadd.f32 %v500_v10, %v3045_v8 }
  0xda   : > { %v550_v13 = vadd.f32 %v549_v11, %v501_v12 }
  0xdc   : > { %v589_v14 = vsub.f32 0.0, %v550_v13 }
  0xde   : > { %v605_v15 = vmul.f32 1.442695, %v589_v14 }
  0xdf   : > { %v502_v16 = vpop.f32.mrf.mxu0 }
  0xe0   : > { %v551_v17 = vpop.f32.mrf.mxu1  ;;  %v503_v18 = vadd.f32 %v502_v16, %v3045_v8  ;;  %2287 = vpow2.f32 %v605_v15 }
  0xe2   : > { %v552_v19 = vadd.f32 %v551_v17, %v503_v18 }
  0xe4   : > { %v590_v20 = vsub.f32 0.0, %v552_v19 }
  0xe6   : > { %v607_v21 = vmul.f32 1.442695, %v590_v20  ;;  %v2288_v25 = vpop.eup %2287 }
  0xe7   : > { %v505_v22 = vpop.f32.mrf.mxu0  ;;  %v637_v27 = vadd.f32 1.0, %v2288_v25 }
  0xe8   : > { %v554_v23 = vpop.f32.mrf.mxu1  ;;  %2289 = vpow2.f32 %v607_v21  ;;  %v506_v24 = vadd.f32 %v505_v22, %v3045_v8 }
  0xe9   : > { %2291 = vrcp.f32 %v637_v27 }
  0xea   : > { %v555_v26 = vadd.f32 %v554_v23, %v506_v24 }
  0xec   : > { %v591_v28 = vsub.f32 0.0, %v555_v26 }
  0xee   : > { %v2290_v29 = vpop.eup %2289  ;;  %v609_v31 = vmul.f32 1.442695, %v591_v28 }
  0xef   : > { %v638_v30 = vadd.f32 1.0, %v2290_v29  ;;  %v507_v32 = vpop.f32.mrf.mxu0  ;;  %v2292_v37 = vpop.eup %2291 }
  0xf0   : > { %v556_v33 = vpop.f32.mrf.mxu1  ;;  %v508_v34 = vadd.f32 %v507_v32, %v3045_v8 }
  0xf1   : > { %2293 = vrcp.f32 %v638_v30 }
  0xf2   : > { %v557_v35 = vadd.f32 %v556_v33, %v508_v34  ;;  %2295 = vpow2.f32 %v609_v31 }
  0xf4   : > { %v592_v36 = vsub.f32 0.0, %v557_v35 }
  0xf6   : > { %v611_v38 = vmul.f32 1.442695, %v592_v36 }
  0xf7   : > { %v2294_v39 = vpop.eup %2293  ;;  %v510_v40 = vpop.f32.mrf.mxu0 }
  0xf8   : > { %v559_v41 = vpop.f32.mrf.mxu1  ;;  %2297 = vpow2.f32 %v611_v38  ;;  %v511_v42 = vadd.f32 %v510_v40, %v3045_v8  ;;  %v669_v43 = vpack.c.bf16 %v2294_v39, %v2292_v37  ;;  %v2296_v44 = vpop.eup %2295 }
  0xf9   : > { %v639_v46 = vadd.f32 1.0, %v2296_v44 }
  0xfa   : > { %v560_v45 = vadd.f32 %v559_v41, %v511_v42  ;;  %750 = vmatmul.bf16.vlgmr.msra.gmra.mxu2 %v669_v43 }
  0xfb   : > { %2299 = vrcp.f32 %v639_v46 }
  0xfc   : > { %v593_v47 = vsub.f32 0.0, %v560_v45 }
  0xfe   : > { %v2298_v48 = vpop.eup %2297  ;;  %v613_v50 = vmul.f32 1.442695, %v593_v47 }
  0xff   : > { %v640_v49 = vadd.f32 1.0, %v2298_v48  ;;  %v512_v51 = vpop.f32.mrf.mxu0 }
 0x100   : > { %v561_v52 = vpop.f32.mrf.mxu1  ;;  %v513_v53 = vadd.f32 %v512_v51, %v3045_v8 }
 0x101   : > { %2301 = vrcp.f32 %v640_v49  ;;  %v2300_v56 = vpop.eup %2299 }
 0x102   : > { %v562_v54 = vadd.f32 %v561_v52, %v513_v53  ;;  %2303 = vpow2.f32 %v613_v50 }
 0x104   : > { %v594_v55 = vsub.f32 0.0, %v562_v54 }
 0x106   : > { %v615_v57 = vmul.f32 1.442695, %v594_v55 }
 0x107   : > { %v2302_v58 = vpop.eup %2301  ;;  %v515_v59 = vpop.f32.mrf.mxu0 }
 0x108   : > { %v564_v60 = vpop.f32.mrf.mxu1  ;;  %2305 = vpow2.f32 %v615_v57  ;;  %v516_v61 = vadd.f32 %v515_v59, %v3045_v8  ;;  %v670_v62 = vpack.c.bf16 %v2302_v58, %v2300_v56  ;;  %v2304_v63 = vpop.eup %2303 }
 0x109   : > { %v641_v1 = vadd.f32 1.0, %v2304_v63 }
 0x10a   : > { %v565_v0 = vadd.f32 %v564_v60, %v516_v61  ;;  %755 = vmatmul.bf16.gmra.mxu2 %v670_v62 }
 0x10b   : > { %2307 = vrcp.f32 %v641_v1 }
 0x10c   : > { %v595_v2 = vsub.f32 0.0, %v565_v0 }
 0x10e   : > { %v2306_v3 = vpop.eup %2305  ;;  %v617_v5 = vmul.f32 1.442695, %v595_v2 }
 0x10f   : > { %v642_v4 = vadd.f32 1.0, %v2306_v3  ;;  %v517_v7 = vpop.f32.mrf.mxu0 }
 0x110   : > { %v566_v9 = vpop.f32.mrf.mxu1  ;;  %v518_v10 = vadd.f32 %v517_v7, %v3045_v8 }
 0x111   : > { %2309 = vrcp.f32 %v642_v4  ;;  %v2308_v13 = vpop.eup %2307 }
 0x112   : > { %v567_v11 = vadd.f32 %v566_v9, %v518_v10  ;;  %2311 = vpow2.f32 %v617_v5 }
 0x114   : > { %v596_v12 = vsub.f32 0.0, %v567_v11 }
 0x116   : > { %v619_v14 = vmul.f32 1.442695, %v596_v12 }
 0x117   : > { %v2310_v15 = vpop.eup %2309  ;;  %v520_v16 = vpop.f32.mrf.mxu0 }
 0x118   : > { %v569_v17 = vpop.f32.mrf.mxu1  ;;  %2313 = vpow2.f32 %v619_v14  ;;  %v521_v18 = vadd.f32 %v520_v16, %v3045_v8  ;;  %v671_v19 = vpack.c.bf16 %v2310_v15, %v2308_v13  ;;  %v2312_v20 = vpop.eup %2311 }
 0x119   : > { %v643_v22 = vadd.f32 1.0, %v2312_v20 }
 0x11a   : > { %v570_v21 = vadd.f32 %v569_v17, %v521_v18  ;;  %760 = vmatmul.bf16.gmra.mxu2 %v671_v19 }
 0x11b   : > { %2315 = vrcp.f32 %v643_v22 }
 0x11c   : > { %v597_v23 = vsub.f32 0.0, %v570_v21 }
 0x11e   : > { %v2314_v24 = vpop.eup %2313  ;;  %v621_v26 = vmul.f32 1.442695, %v597_v23 }
 0x11f   : > { %v644_v25 = vadd.f32 1.0, %v2314_v24  ;;  %v522_v27 = vpop.f32.mrf.mxu0 }
 0x120   : > { %v571_v28 = vpop.f32.mrf.mxu1  ;;  %v523_v29 = vadd.f32 %v522_v27, %v3045_v8 }
 0x121   : > { %2317 = vrcp.f32 %v644_v25  ;;  %v2316_v32 = vpop.eup %2315 }
 0x122   : > { %v572_v30 = vadd.f32 %v571_v28, %v523_v29  ;;  %2319 = vpow2.f32 %v621_v26 }
 0x124   : > { %v598_v31 = vsub.f32 0.0, %v572_v30 }
 0x126   : > { %v623_v33 = vmul.f32 1.442695, %v598_v31 }
 0x127   : > { %v2318_v34 = vpop.eup %2317  ;;  %v525_v35 = vpop.f32.mrf.mxu0 }
 0x128   : > { %v574_v36 = vpop.f32.mrf.mxu1  ;;  %2321 = vpow2.f32 %v623_v33  ;;  %v526_v37 = vadd.f32 %v525_v35, %v3045_v8  ;;  %v672_v38 = vpack.c.bf16 %v2318_v34, %v2316_v32  ;;  %v2320_v39 = vpop.eup %2319  ;;  %v2157_v33 = vld [vmem:[#allocation7 + $0x78] sm:$0xff] }
 0x129   : > { %v645_v41 = vadd.f32 1.0, %v2320_v39  ;;  %945 = vmatpush.bf16.msra.mxu3 %v2157_v33 }
 0x12a   : > { %v575_v40 = vadd.f32 %v574_v36, %v526_v37  ;;  %765 = vmatmul.bf16.gmra.mxu2 %v672_v38  ;;  %v2155_v36 = vld [vmem:[#allocation7 + $0x68] sm:$0xff] }
 0x12b   : > { %2323 = vrcp.f32 %v645_v41  ;;  %v2153_v41 = vld [vmem:[#allocation7 + $0x58] sm:$0xff] }
 0x12c   : > { %v599_v42 = vsub.f32 0.0, %v575_v40  ;;  %v2154_v40 = vld [vmem:[#allocation7 + $0x60] sm:$0xff] }
 0x12e   : > { %v2322_v43 = vpop.eup %2321  ;;  %v625_v45 = vmul.f32 1.442695, %v599_v42  ;;  %v2152_v42 = vld [vmem:[#allocation7 + $0x50] sm:$0xff] }
 0x12f   : > { %v646_v44 = vadd.f32 1.0, %v2322_v43  ;;  %v527_v46 = vpop.f32.mrf.mxu0  ;;  %v2151_v43 = vld [vmem:[#allocation7 + $0x48] sm:$0xff] }
 0x130   : > { %v576_v47 = vpop.f32.mrf.mxu1  ;;  %v528_v48 = vadd.f32 %v527_v46, %v3045_v8 }
 0x131   : > { %2325 = vrcp.f32 %v646_v44  ;;  %v2324_v51 = vpop.eup %2323  ;;  %v2150_v44 = vld [vmem:[#allocation7 + $0x40] sm:$0xff] }
 0x132   : > { %v577_v49 = vadd.f32 %v576_v47, %v528_v48  ;;  %2327 = vpow2.f32 %v625_v45  ;;  %v3064_v45 = vperm.slane %v3042_v6, 1 }
 0x134   : > { %v600_v50 = vsub.f32 0.0, %v577_v49 }
 0x136   : > { %v627_v52 = vmul.f32 1.442695, %v600_v50 }
 0x137   : > { %v2326_v53 = vpop.eup %2325  ;;  %v530_v54 = vpop.f32.mrf.mxu0 }
 0x138   : > { %v579_v55 = vpop.f32.mrf.mxu1  ;;  %2329 = vpow2.f32 %v627_v52  ;;  %v531_v56 = vadd.f32 %v530_v54, %v3045_v8  ;;  %v673_v57 = vpack.c.bf16 %v2326_v53, %v2324_v51  ;;  %v2328_v58 = vpop.eup %2327 }
 0x139   : > { %v647_v60 = vadd.f32 1.0, %v2328_v58 }
 0x13a   : > { %v580_v59 = vadd.f32 %v579_v55, %v531_v56  ;;  %770 = vmatmul.bf16.gmra.mxu2 %v673_v57 }
 0x13b   : > { %2331 = vrcp.f32 %v647_v60 }
 0x13c   : > { %v601_v61 = vsub.f32 0.0, %v580_v59 }
 0x13e   : > { %v2330_v62 = vpop.eup %2329  ;;  %v629_v0 = vmul.f32 1.442695, %v601_v61 }
 0x13f   : > { %v648_v63 = vadd.f32 1.0, %v2330_v62  ;;  %v532_v1 = vpop.f32.mrf.mxu0 }
 0x140   : > { %v581_v2 = vpop.f32.mrf.mxu1  ;;  %v533_v3 = vadd.f32 %v532_v1, %v3045_v8 }
 0x141   : > { %2333 = vrcp.f32 %v648_v63  ;;  %v2332_v7 = vpop.eup %2331 }
 0x142   : > { %v582_v4 = vadd.f32 %v581_v2, %v533_v3  ;;  %2335 = vpow2.f32 %v629_v0 }
 0x144   : > { %v602_v5 = vsub.f32 0.0, %v582_v4 }
 0x146   : > { %v631_v9 = vmul.f32 1.442695, %v602_v5 }
 0x147   : > { %v2334_v10 = vpop.eup %2333  ;;  %v535_v11 = vpop.f32.mrf.mxu0 }
 0x148   : > { %v584_v12 = vpop.f32.mrf.mxu1  ;;  %2337 = vpow2.f32 %v631_v9  ;;  %v536_v13 = vadd.f32 %v535_v11, %v3045_v8  ;;  %v674_v14 = vpack.c.bf16 %v2334_v10, %v2332_v7  ;;  %v2336_v15 = vpop.eup %2335 }
 0x149   : > { %v649_v17 = vadd.f32 1.0, %v2336_v15 }
 0x14a   : > { %v585_v16 = vadd.f32 %v584_v12, %v536_v13  ;;  %775 = vmatmul.bf16.gmra.mxu2 %v674_v14 }
 0x14b   : > { %2339 = vrcp.f32 %v649_v17 }
 0x14c   : > { %v603_v18 = vsub.f32 0.0, %v585_v16 }
 0x14e   : > { %v2338_v19 = vpop.eup %2337  ;;  %v633_v21 = vmul.f32 1.442695, %v603_v18 }
 0x14f   : > { %v650_v20 = vadd.f32 1.0, %v2338_v19  ;;  %v537_v22 = vpop.f32.mrf.mxu0 }
 0x150   : > { %v538_v23 = vadd.f32 %v537_v22, %v3045_v8  ;;  %v586_v24 = vpop.f32.mrf.mxu1  ;;  %v2156_v8 = vld [vmem:[#allocation7 + $0x70] sm:$0xff] }
 0x151   : > { %2341 = vrcp.f32 %v650_v20  ;;  %v2340_v27 = vpop.eup %2339  ;;  %946 = vmatpush.bf16.msra.mxu3 %v2156_v8 }
 0x152   : > { %v587_v25 = vadd.f32 %v586_v24, %v538_v23  ;;  %2343 = vpow2.f32 %v633_v21  ;;  %v2165_v24 = vld [vmem:[#allocation7 + $0xb8] sm:$0xff] }
 0x153   : > { %1148 = vmatpush.bf16.msrb.mxu0 %v2165_v24 }
 0x154   : > { %v604_v26 = vsub.f32 0.0, %v587_v25 }
 0x155   : > { %947 = vmatpush.bf16.msra.mxu3 %v2155_v36 }
 0x156   : > { %v635_v28 = vmul.f32 1.442695, %v604_v26 }
 0x157   : > { %v2342_v29 = vpop.eup %2341 }
 0x158   : > { %2345 = vpow2.f32 %v635_v28  ;;  %v675_v30 = vpack.c.bf16 %v2342_v29, %v2340_v27  ;;  %v2344_v31 = vpop.eup %2343 }
 0x159   : > { %v651_v32 = vadd.f32 1.0, %v2344_v31  ;;  %948 = vmatpush.bf16.msra.mxu3 %v2154_v40 }
 0x15a   : > { %780 = vmatmul.bf16.gmra.mxu2 %v675_v30 }
 0x15b   : > { %2347 = vrcp.f32 %v651_v32 }
 0x15d   : > { %949 = vmatpush.bf16.msra.mxu3 %v2153_v41 }
 0x15e   : > { %v2346_v34 = vpop.eup %2345 }
 0x15f   : > { %v652_v35 = vadd.f32 1.0, %v2346_v34 }
 0x161   : > { %2349 = vrcp.f32 %v652_v35  ;;  %v2348_v37 = vpop.eup %2347  ;;  %950 = vmatpush.bf16.msra.mxu3 %v2152_v42 }
 0x165   : > { %951 = vmatpush.bf16.msra.mxu3 %v2151_v43 }
 0x167   : > { %v2350_v38 = vpop.eup %2349 }
 0x168   : > { %v676_v39 = vpack.c.bf16 %v2350_v38, %v2348_v37 }
 0x169   : > { %952 = vmatpush.bf16.msra.mxu3 %v2150_v44 }
 0x16a   : > { %785 = vmatmul.bf16.gmra.mxu2 %v676_v39  ;;  %v2164_v39 = vld [vmem:[#allocation7 + $0xb0] sm:$0xff] }
 0x16b   : > { %1149 = vmatpush.bf16.msrb.mxu0 %v2164_v39 }
 0x17d   : > { %v751_v46 = vpop.f32.mrf.mxu2 }
 0x17e   : > { %v752_v47 = vadd.f32 %v751_v46, %v3064_v45 }
 0x180   : > { %v791_v48 = vsub.f32 0.0, %v752_v47 }
 0x182   : > { %v807_v49 = vmul.f32 1.442695, %v791_v48 }
 0x184   : > { %2351 = vpow2.f32 %v807_v49 }
 0x185   : > { %v753_v50 = vpop.f32.mrf.mxu2 }
 0x186   : > { %v754_v51 = vadd.f32 %v753_v50, %v3064_v45 }
 0x188   : > { %v792_v52 = vsub.f32 0.0, %v754_v51 }
 0x18a   : > { %v809_v53 = vmul.f32 1.442695, %v792_v52  ;;  %v2352_v54 = vpop.eup %2351 }
 0x18b   : > { %v839_v57 = vadd.f32 1.0, %v2352_v54 }
 0x18c   : > { %2353 = vpow2.f32 %v809_v53 }
 0x18d   : > { %v756_v55 = vpop.f32.mrf.mxu2  ;;  %2355 = vrcp.f32 %v839_v57 }
 0x18e   : > { %v757_v56 = vadd.f32 %v756_v55, %v3064_v45 }
 0x190   : > { %v793_v58 = vsub.f32 0.0, %v757_v56  ;;  %v2163_v56 = vld [vmem:[#allocation7 + $0xa8] sm:$0xff] }
 0x191   : > { %1150 = vmatpush.bf16.msrb.mxu0 %v2163_v56 }
 0x192   : > { %v2354_v59 = vpop.eup %2353  ;;  %v811_v61 = vmul.f32 1.442695, %v793_v58 }
 0x193   : > { %v840_v60 = vadd.f32 1.0, %v2354_v59  ;;  %v2356_v1 = vpop.eup %2355 }
 0x195   : > { %2357 = vrcp.f32 %v840_v60  ;;  %v758_v62 = vpop.f32.mrf.mxu2 }
 0x196   : > { %v759_v63 = vadd.f32 %v758_v62, %v3064_v45  ;;  %2359 = vpow2.f32 %v811_v61 }
 0x198   : > { %v794_v0 = vsub.f32 0.0, %v759_v63 }
 0x19a   : > { %v813_v2 = vmul.f32 1.442695, %v794_v0 }
 0x19b   : > { %v2358_v3 = vpop.eup %2357 }
 0x19c   : > { %2361 = vpow2.f32 %v813_v2  ;;  %v871_v4 = vpack.c.bf16 %v2358_v3, %v2356_v1  ;;  %v2360_v5 = vpop.eup %2359 }
 0x19d   : > { %v761_v7 = vpop.f32.mrf.mxu2  ;;  %v841_v10 = vadd.f32 1.0, %v2360_v5 }
 0x19e   : > { %v762_v9 = vadd.f32 %v761_v7, %v3064_v45  ;;  %953 = vmatmul.bf16.vlgmr.msra.gmra.mxu3 %v871_v4 }
 0x19f   : > { %2363 = vrcp.f32 %v841_v10  ;;  %v2162_v10 = vld [vmem:[#allocation7 + $0xa0] sm:$0xff] }
 0x1a0   : > { %v795_v11 = vsub.f32 0.0, %v762_v9  ;;  %1151 = vmatpush.bf16.msrb.mxu0 %v2162_v10 }
 0x1a2   : > { %v2362_v12 = vpop.eup %2361  ;;  %v815_v14 = vmul.f32 1.442695, %v795_v11 }
 0x1a3   : > { %v842_v13 = vadd.f32 1.0, %v2362_v12 }
 0x1a5   : > { %2365 = vrcp.f32 %v842_v13  ;;  %v763_v15 = vpop.f32.mrf.mxu2  ;;  %v2364_v18 = vpop.eup %2363 }
 0x1a6   : > { %v764_v16 = vadd.f32 %v763_v15, %v3064_v45  ;;  %2367 = vpow2.f32 %v815_v14 }
 0x1a8   : > { %v796_v17 = vsub.f32 0.0, %v764_v16 }
 0x1aa   : > { %v817_v19 = vmul.f32 1.442695, %v796_v17 }
 0x1ab   : > { %v2366_v20 = vpop.eup %2365 }
 0x1ac   : > { %2369 = vpow2.f32 %v817_v19  ;;  %v872_v21 = vpack.c.bf16 %v2366_v20, %v2364_v18  ;;  %v2368_v22 = vpop.eup %2367  ;;  %v2161_v18 = vld [vmem:[#allocation7 + $0x98] sm:$0xff] }
 0x1ad   : > { %v766_v23 = vpop.f32.mrf.mxu2  ;;  %v843_v26 = vadd.f32 1.0, %v2368_v22  ;;  %1152 = vmatpush.bf16.msrb.mxu0 %v2161_v18 }
 0x1ae   : > { %v767_v25 = vadd.f32 %v766_v23, %v3064_v45  ;;  %958 = vmatmul.bf16.gmra.mxu3 %v872_v21 }
 0x1af   : > { %2371 = vrcp.f32 %v843_v26 }
 0x1b0   : > { %v797_v27 = vsub.f32 0.0, %v767_v25 }
 0x1b2   : > { %v2370_v28 = vpop.eup %2369  ;;  %v819_v30 = vmul.f32 1.442695, %v797_v27 }
 0x1b3   : > { %v844_v29 = vadd.f32 1.0, %v2370_v28  ;;  %v2160_v28 = vld [vmem:[#allocation7 + $0x90] sm:$0xff] }
 0x1b4   : > { %1153 = vmatpush.bf16.msrb.mxu0 %v2160_v28 }
 0x1b5   : > { %2373 = vrcp.f32 %v844_v29  ;;  %v768_v31 = vpop.f32.mrf.mxu2  ;;  %v2372_v34 = vpop.eup %2371 }
 0x1b6   : > { %v769_v32 = vadd.f32 %v768_v31, %v3064_v45  ;;  %2375 = vpow2.f32 %v819_v30 }
 0x1b8   : > { %v798_v33 = vsub.f32 0.0, %v769_v32 }
 0x1ba   : > { %v821_v35 = vmul.f32 1.442695, %v798_v33 }
 0x1bb   : > { %v2374_v8 = vpop.eup %2373 }
 0x1bc   : > { %2377 = vpow2.f32 %v821_v35  ;;  %v873_v36 = vpack.c.bf16 %v2374_v8, %v2372_v34  ;;  %v2376_v37 = vpop.eup %2375 }
 0x1bd   : > { %v771_v38 = vpop.f32.mrf.mxu2  ;;  %v845_v41 = vadd.f32 1.0, %v2376_v37 }
 0x1be   : > { %v772_v40 = vadd.f32 %v771_v38, %v3064_v45  ;;  %963 = vmatmul.bf16.gmra.mxu3 %v873_v36 }
 0x1bf   : > { %2379 = vrcp.f32 %v845_v41 }
 0x1c0   : > { %v799_v42 = vsub.f32 0.0, %v772_v40 }
 0x1c2   : > { %v2378_v43 = vpop.eup %2377  ;;  %v823_v46 = vmul.f32 1.442695, %v799_v42 }
 0x1c3   : > { %v846_v44 = vadd.f32 1.0, %v2378_v43 }
 0x1c5   : > { %2381 = vrcp.f32 %v846_v44  ;;  %v773_v47 = vpop.f32.mrf.mxu2  ;;  %v2380_v50 = vpop.eup %2379 }
 0x1c6   : > { %v774_v48 = vadd.f32 %v773_v47, %v3064_v45  ;;  %2383 = vpow2.f32 %v823_v46 }
 0x1c8   : > { %v800_v49 = vsub.f32 0.0, %v774_v48  ;;  %v2159_v48 = vld [vmem:[#allocation7 + $0x88] sm:$0xff] }
 0x1c9   : > { %1154 = vmatpush.bf16.msrb.mxu0 %v2159_v48 }
 0x1ca   : > { %v825_v51 = vmul.f32 1.442695, %v800_v49  ;;  %v3083_v49 = vperm.slane %v3042_v6, 2 }
 0x1cb   : > { %v2382_v52 = vpop.eup %2381 }
 0x1cc   : > { %2385 = vpow2.f32 %v825_v51  ;;  %v874_v53 = vpack.c.bf16 %v2382_v52, %v2380_v50  ;;  %v2384_v54 = vpop.eup %2383 }
 0x1cd   : > { %v776_v55 = vpop.f32.mrf.mxu2  ;;  %v847_v58 = vadd.f32 1.0, %v2384_v54 }
 0x1ce   : > { %v777_v57 = vadd.f32 %v776_v55, %v3064_v45  ;;  %968 = vmatmul.bf16.gmra.mxu3 %v874_v53 }
 0x1cf   : > { %2387 = vrcp.f32 %v847_v58 }
 0x1d0   : > { %v801_v59 = vsub.f32 0.0, %v777_v57 }
 0x1d2   : > { %v2386_v60 = vpop.eup %2385  ;;  %v827_v62 = vmul.f32 1.442695, %v801_v59 }
 0x1d3   : > { %v848_v61 = vadd.f32 1.0, %v2386_v60 }
 0x1d5   : > { %2389 = vrcp.f32 %v848_v61  ;;  %v778_v63 = vpop.f32.mrf.mxu2  ;;  %v2388_v2 = vpop.eup %2387 }
 0x1d6   : > { %v779_v0 = vadd.f32 %v778_v63, %v3064_v45  ;;  %2391 = vpow2.f32 %v827_v62 }
 0x1d8   : > { %v802_v1 = vsub.f32 0.0, %v779_v0 }
 0x1da   : > { %v829_v3 = vmul.f32 1.442695, %v802_v1 }
 0x1db   : > { %v2390_v4 = vpop.eup %2389 }
 0x1dc   : > { %2393 = vpow2.f32 %v829_v3  ;;  %v875_v5 = vpack.c.bf16 %v2390_v4, %v2388_v2  ;;  %v2392_v7 = vpop.eup %2391 }
 0x1dd   : > { %v781_v9 = vpop.f32.mrf.mxu2  ;;  %v849_v12 = vadd.f32 1.0, %v2392_v7 }
 0x1de   : > { %v782_v11 = vadd.f32 %v781_v9, %v3064_v45  ;;  %973 = vmatmul.bf16.gmra.mxu3 %v875_v5 }
 0x1df   : > { %2395 = vrcp.f32 %v849_v12 }
 0x1e0   : > { %v803_v13 = vsub.f32 0.0, %v782_v11 }
 0x1e2   : > { %v2394_v14 = vpop.eup %2393  ;;  %v831_v16 = vmul.f32 1.442695, %v803_v13 }
 0x1e3   : > { %v850_v15 = vadd.f32 1.0, %v2394_v14 }
 0x1e5   : > { %2397 = vrcp.f32 %v850_v15  ;;  %v783_v17 = vpop.f32.mrf.mxu2  ;;  %v2396_v21 = vpop.eup %2395 }
 0x1e6   : > { %v784_v19 = vadd.f32 %v783_v17, %v3064_v45  ;;  %2399 = vpow2.f32 %v831_v16 }
 0x1e8   : > { %v804_v20 = vsub.f32 0.0, %v784_v19  ;;  %v2173_v19 = vld [vmem:[#allocation7 + $0xf8] sm:$0xff] }
 0x1e9   : > { %1351 = vmatpush.bf16.msrb.mxu1 %v2173_v19 }
 0x1ea   : > { %v833_v22 = vmul.f32 1.442695, %v804_v20 }
 0x1eb   : > { %v2398_v23 = vpop.eup %2397 }
 0x1ec   : > { %2401 = vpow2.f32 %v833_v22  ;;  %v876_v24 = vpack.c.bf16 %v2398_v23, %v2396_v21  ;;  %v2400_v25 = vpop.eup %2399 }
 0x1ed   : > { %v786_v26 = vpop.f32.mrf.mxu2  ;;  %v851_v29 = vadd.f32 1.0, %v2400_v25 }
 0x1ee   : > { %v787_v27 = vadd.f32 %v786_v26, %v3064_v45  ;;  %978 = vmatmul.bf16.gmra.mxu3 %v876_v24 }
 0x1ef   : > { %2403 = vrcp.f32 %v851_v29 }
 0x1f0   : > { %v805_v30 = vsub.f32 0.0, %v787_v27 }
 0x1f2   : > { %v2402_v31 = vpop.eup %2401  ;;  %v835_v33 = vmul.f32 1.442695, %v805_v30 }
 0x1f3   : > { %v852_v32 = vadd.f32 1.0, %v2402_v31 }
 0x1f5   : > { %2405 = vrcp.f32 %v852_v32  ;;  %v788_v34 = vpop.f32.mrf.mxu2  ;;  %v2404_v36 = vpop.eup %2403 }
 0x1f6   : > { %v789_v35 = vadd.f32 %v788_v34, %v3064_v45  ;;  %2407 = vpow2.f32 %v835_v33  ;;  %v2158_v45 = vld [vmem:[#allocation7 + $0x80] sm:$0xff] }
 0x1f7   : > { %1155 = vmatpush.bf16.msrb.mxu0 %v2158_v45 }
 0x1f8   : > { %v806_v8 = vsub.f32 0.0, %v789_v35  ;;  %v2172_v35 = vld [vmem:[#allocation7 + $0xf0] sm:$0xff] }
 0x1f9   : > { %1352 = vmatpush.bf16.msrb.mxu1 %v2172_v35 }
 0x1fa   : > { %v837_v37 = vmul.f32 1.442695, %v806_v8 }
 0x1fb   : > { %v2406_v38 = vpop.eup %2405 }
 0x1fc   : > { %2409 = vpow2.f32 %v837_v37  ;;  %v877_v39 = vpack.c.bf16 %v2406_v38, %v2404_v36  ;;  %v2408_v40 = vpop.eup %2407 }
 0x1fd   : > { %v853_v41 = vadd.f32 1.0, %v2408_v40 }
 0x1fe   : > { %983 = vmatmul.bf16.gmra.mxu3 %v877_v39 }
 0x1ff   : > { %2411 = vrcp.f32 %v853_v41 }
 0x202   : > { %v2410_v42 = vpop.eup %2409 }
 0x203   : > { %v854_v43 = vadd.f32 1.0, %v2410_v42 }
 0x205   : > { %2413 = vrcp.f32 %v854_v43  ;;  %v2412_v44 = vpop.eup %2411 }
 0x20b   : > { %v2414_v46 = vpop.eup %2413 }
 0x20c   : > { %v878_v47 = vpack.c.bf16 %v2414_v46, %v2412_v44 }
 0x20e   : > { %988 = vmatmul.bf16.gmra.mxu3 %v878_v47 }
 0x221   : > { %v954_v50 = vpop.f32.mrf.mxu3 }
 0x222   : > { %v955_v51 = vadd.f32 %v954_v50, %v3083_v49 }
 0x224   : > { %v994_v52 = vsub.f32 0.0, %v955_v51  ;;  %v2171_v51 = vld [vmem:[#allocation7 + $0xe8] sm:$0xff] }
 0x225   : > { %1353 = vmatpush.bf16.msrb.mxu1 %v2171_v51  ;;  %v3101_v51 = vld [vmem:[#allocation10] sm:$0xff] }
 0x226   : > { %v1010_v53 = vmul.f32 1.442695, %v994_v52 }
 0x228   : > { %2415 = vpow2.f32 %v1010_v53 }
 0x229   : > { %v956_v54 = vpop.f32.mrf.mxu3 }
 0x22a   : > { %v957_v55 = vadd.f32 %v956_v54, %v3083_v49 }
 0x22c   : > { %v995_v56 = vsub.f32 0.0, %v957_v55 }
 0x22e   : > { %v1012_v57 = vmul.f32 1.442695, %v995_v56  ;;  %v2416_v58 = vpop.eup %2415 }
 0x22f   : > { %v1042_v61 = vadd.f32 1.0, %v2416_v58 }
 0x230   : > { %2417 = vpow2.f32 %v1012_v57 }
 0x231   : > { %v959_v59 = vpop.f32.mrf.mxu3  ;;  %2419 = vrcp.f32 %v1042_v61 }
 0x232   : > { %v960_v60 = vadd.f32 %v959_v59, %v3083_v49 }
 0x234   : > { %v996_v6 = vsub.f32 0.0, %v960_v60 }
 0x236   : > { %v2418_v62 = vpop.eup %2417  ;;  %v1014_v0 = vmul.f32 1.442695, %v996_v6 }
 0x237   : > { %v1043_v63 = vadd.f32 1.0, %v2418_v62  ;;  %v2420_v4 = vpop.eup %2419 }
 0x239   : > { %2421 = vrcp.f32 %v1043_v63  ;;  %v961_v1 = vpop.f32.mrf.mxu3 }
 0x23a   : > { %v962_v2 = vadd.f32 %v961_v1, %v3083_v49  ;;  %2423 = vpow2.f32 %v1014_v0 }
 0x23c   : > { %v997_v3 = vsub.f32 0.0, %v962_v2  ;;  %v2170_v2 = vld [vmem:[#allocation7 + $0xe0] sm:$0xff] }
 0x23d   : > { %1354 = vmatpush.bf16.msrb.mxu1 %v2170_v2 }
 0x23e   : > { %v1016_v5 = vmul.f32 1.442695, %v997_v3 }
 0x23f   : > { %v2422_v7 = vpop.eup %2421 }
 0x240   : > { %2425 = vpow2.f32 %v1016_v5  ;;  %v1074_v9 = vpack.c.bf16 %v2422_v7, %v2420_v4  ;;  %v2424_v10 = vpop.eup %2423 }
 0x241   : > { %v964_v11 = vpop.f32.mrf.mxu3  ;;  %v1044_v13 = vadd.f32 1.0, %v2424_v10 }
 0x242   : > { %v965_v12 = vadd.f32 %v964_v11, %v3083_v49  ;;  %1156 = vmatmul.bf16.vlgmr.msrb.gmra.mxu0 %v1074_v9 }
 0x243   : > { %2427 = vrcp.f32 %v1044_v13 }
 0x244   : > { %v998_v14 = vsub.f32 0.0, %v965_v12 }
 0x246   : > { %v2426_v15 = vpop.eup %2425  ;;  %v1018_v17 = vmul.f32 1.442695, %v998_v14 }
 0x247   : > { %v1045_v16 = vadd.f32 1.0, %v2426_v15 }
 0x249   : > { %2429 = vrcp.f32 %v1045_v16  ;;  %v966_v18 = vpop.f32.mrf.mxu3  ;;  %v2428_v22 = vpop.eup %2427 }
 0x24a   : > { %v967_v20 = vadd.f32 %v966_v18, %v3083_v49  ;;  %2431 = vpow2.f32 %v1018_v17 }
 0x24c   : > { %v999_v21 = vsub.f32 0.0, %v967_v20  ;;  %v2169_v20 = vld [vmem:[#allocation7 + $0xd8] sm:$0xff] }
 0x24d   : > { %1355 = vmatpush.bf16.msrb.mxu1 %v2169_v20 }
 0x24e   : > { %v1020_v23 = vmul.f32 1.442695, %v999_v21 }
 0x24f   : > { %v2430_v24 = vpop.eup %2429 }
 0x250   : > { %2433 = vpow2.f32 %v1020_v23  ;;  %v1075_v25 = vpack.c.bf16 %v2430_v24, %v2428_v22  ;;  %v2432_v26 = vpop.eup %2431  ;;  %v2168_v22 = vld [vmem:[#allocation7 + $0xd0] sm:$0xff] }
 0x251   : > { %v969_v27 = vpop.f32.mrf.mxu3  ;;  %v1046_v29 = vadd.f32 1.0, %v2432_v26  ;;  %1356 = vmatpush.bf16.msrb.mxu1 %v2168_v22  ;;  %v2112_v22 = vld [vmem:[#allocation8 + $0x70] sm:$0xf] }
 0x252   : > { %v970_v28 = vadd.f32 %v969_v27, %v3083_v49  ;;  %1161 = vmatmul.bf16.gmra.mxu0 %v1075_v25 }
 0x253   : > { %2435 = vrcp.f32 %v1046_v29 }
 0x254   : > { %v1000_v30 = vsub.f32 0.0, %v970_v28 }
 0x256   : > { %v2434_v31 = vpop.eup %2433  ;;  %v1022_v33 = vmul.f32 1.442695, %v1000_v30 }
 0x257   : > { %v1047_v32 = vadd.f32 1.0, %v2434_v31 }
 0x259   : > { %2437 = vrcp.f32 %v1047_v32  ;;  %v971_v34 = vpop.f32.mrf.mxu3  ;;  %v2436_v37 = vpop.eup %2435 }
 0x25a   : > { %v972_v8 = vadd.f32 %v971_v34, %v3083_v49  ;;  %2439 = vpow2.f32 %v1022_v33 }
 0x25c   : > { %v1001_v36 = vsub.f32 0.0, %v972_v8 }
 0x25e   : > { %v1024_v38 = vmul.f32 1.442695, %v1001_v36 }
 0x25f   : > { %v2438_v39 = vpop.eup %2437 }
 0x260   : > { %2441 = vpow2.f32 %v1024_v38  ;;  %v1076_v40 = vpack.c.bf16 %v2438_v39, %v2436_v37  ;;  %v2440_v41 = vpop.eup %2439 }
 0x261   : > { %v974_v42 = vpop.f32.mrf.mxu3  ;;  %v1048_v44 = vadd.f32 1.0, %v2440_v41 }
 0x262   : > { %v975_v43 = vadd.f32 %v974_v42, %v3083_v49  ;;  %1166 = vmatmul.bf16.gmra.mxu0 %v1076_v40 }
 0x263   : > { %2443 = vrcp.f32 %v1048_v44 }
 0x264   : > { %v1002_v46 = vsub.f32 0.0, %v975_v43 }
 0x266   : > { %v2442_v47 = vpop.eup %2441  ;;  %v1026_v45 = vmul.f32 1.442695, %v1002_v46 }
 0x267   : > { %v1049_v48 = vadd.f32 1.0, %v2442_v47 }
 0x269   : > { %2445 = vrcp.f32 %v1049_v48  ;;  %v976_v50 = vpop.f32.mrf.mxu3  ;;  %v2444_v54 = vpop.eup %2443 }
 0x26a   : > { %v977_v52 = vadd.f32 %v976_v50, %v3083_v49  ;;  %2447 = vpow2.f32 %v1026_v45  ;;  %v2167_v45 = vld [vmem:[#allocation7 + $0xc8] sm:$0xff] }
 0x26b   : > { %1357 = vmatpush.bf16.msrb.mxu1 %v2167_v45 }
 0x26c   : > { %v1003_v53 = vsub.f32 0.0, %v977_v52  ;;  %v3104_v52 = vperm.slane %v3101_v51, 3 }
 0x26e   : > { %v1028_v55 = vmul.f32 1.442695, %v1003_v53 }
 0x26f   : > { %v2446_v56 = vpop.eup %2445 }
 0x270   : > { %2449 = vpow2.f32 %v1028_v55  ;;  %v1077_v57 = vpack.c.bf16 %v2446_v56, %v2444_v54  ;;  %v2448_v58 = vpop.eup %2447 }
 0x271   : > { %v979_v59 = vpop.f32.mrf.mxu3  ;;  %v1050_v61 = vadd.f32 1.0, %v2448_v58 }
 0x272   : > { %v980_v60 = vadd.f32 %v979_v59, %v3083_v49  ;;  %1171 = vmatmul.bf16.gmra.mxu0 %v1077_v57 }
 0x273   : > { %2451 = vrcp.f32 %v1050_v61 }
 0x274   : > { %v1004_v6 = vsub.f32 0.0, %v980_v60 }
 0x276   : > { %v2450_v62 = vpop.eup %2449  ;;  %v1030_v0 = vmul.f32 1.442695, %v1004_v6 }
 0x277   : > { %v1051_v63 = vadd.f32 1.0, %v2450_v62 }
 0x279   : > { %2453 = vrcp.f32 %v1051_v63  ;;  %v981_v1 = vpop.f32.mrf.mxu3  ;;  %v2452_v5 = vpop.eup %2451 }
 0x27a   : > { %v982_v3 = vadd.f32 %v981_v1, %v3083_v49  ;;  %2455 = vpow2.f32 %v1030_v0 }
 0x27c   : > { %v1005_v4 = vsub.f32 0.0, %v982_v3 }
 0x27e   : > { %v1032_v7 = vmul.f32 1.442695, %v1005_v4 }
 0x27f   : > { %v2454_v9 = vpop.eup %2453 }
 0x280   : > { %2457 = vpow2.f32 %v1032_v7  ;;  %v1078_v10 = vpack.c.bf16 %v2454_v9, %v2452_v5  ;;  %v2456_v11 = vpop.eup %2455 }
 0x281   : > { %v984_v12 = vpop.f32.mrf.mxu3  ;;  %v1052_v14 = vadd.f32 1.0, %v2456_v11 }
 0x282   : > { %v985_v13 = vadd.f32 %v984_v12, %v3083_v49  ;;  %1176 = vmatmul.bf16.gmra.mxu0 %v1078_v10 }
 0x283   : > { %2459 = vrcp.f32 %v1052_v14 }
 0x284   : > { %v1006_v15 = vsub.f32 0.0, %v985_v13 }
 0x286   : > { %v2458_v16 = vpop.eup %2457  ;;  %v1034_v18 = vmul.f32 1.442695, %v1006_v15 }
 0x287   : > { %v1053_v17 = vadd.f32 1.0, %v2458_v16 }
 0x289   : > { %2461 = vrcp.f32 %v1053_v17  ;;  %v986_v19 = vpop.f32.mrf.mxu3  ;;  %v2460_v24 = vpop.eup %2459 }
 0x28a   : > { %v987_v21 = vadd.f32 %v986_v19, %v3083_v49  ;;  %2463 = vpow2.f32 %v1034_v18 }
 0x28c   : > { %v1007_v23 = vsub.f32 0.0, %v987_v21 }
 0x28e   : > { %v1036_v25 = vmul.f32 1.442695, %v1007_v23  ;;  %v2189_v23 = vld [vmem:[#allocation8 + $0x74] sm:$0xf0] }
 0x28f   : > { %v2462_v26 = vpop.eup %2461 }
 0x290   : > { %2465 = vpow2.f32 %v1036_v25  ;;  %v1079_v27 = vpack.c.bf16 %v2462_v26, %v2460_v24  ;;  %v2464_v28 = vpop.eup %2463  ;;  %v2188_v24 = vld [vmem:[#allocation8 + $0x74] sm:$0xf]  ;;  %v2113_v26 = vor.u32 %v2189_v23, %v2112_v22  ;;  %v2088_v23 = vld [vmem:[#allocation8 + $0x40] sm:$0xf] }
 0x291   : > { %v989_v29 = vpop.f32.mrf.mxu3  ;;  %v1054_v31 = vadd.f32 1.0, %v2464_v28 }
 0x292   : > { %v990_v30 = vadd.f32 %v989_v29, %v3083_v49  ;;  %1181 = vmatmul.bf16.gmra.mxu0 %v1079_v27  ;;  %v2114_v27 = vld [vmem:[#allocation8 + $0x78] sm:$0xf0]  ;;  %1586 = vmatpush.bf16.msrb.mxu2 %v2113_v26 }
 0x293   : > { %2467 = vrcp.f32 %v1054_v31  ;;  %v2117_v28 = vor.u32 %v2188_v24, %v2114_v27  ;;  %v2183_v24 = vld [vmem:[#allocation8 + $0x44] sm:$0xf0] }
 0x294   : > { %v1008_v32 = vsub.f32 0.0, %v990_v30  ;;  %v2089_v27 = vor.u32 %v2183_v24, %v2088_v23  ;;  %v2176_v23 = vld [vmem:[#allocation8 + $0x14] sm:$0xf] }
 0x295   : > { %1635 = vmatpush.bf16.msrb.mxu3 %v2117_v28  ;;  %v2090_v28 = vld [vmem:[#allocation8 + $0x48] sm:$0xf0] }
 0x296   : > { %v2466_v33 = vpop.eup %2465  ;;  %v1038_v35 = vmul.f32 1.442695, %v1008_v32 }
 0x297   : > { %v1055_v34 = vadd.f32 1.0, %v2466_v33 }
 0x299   : > { %2469 = vrcp.f32 %v1055_v34  ;;  %v991_v8 = vpop.f32.mrf.mxu3  ;;  %v2468_v38 = vpop.eup %2467 }
 0x29a   : > { %v992_v36 = vadd.f32 %v991_v8, %v3083_v49  ;;  %2471 = vpow2.f32 %v1038_v35  ;;  %v2166_v49 = vld [vmem:[#allocation7 + $0xc0] sm:$0xff] }
 0x29b   : > { %1358 = vmatpush.bf16.msrb.mxu1 %v2166_v49 }
 0x29c   : > { %v1009_v37 = vsub.f32 0.0, %v992_v36 }
 0x29e   : > { %v1040_v39 = vmul.f32 1.442695, %v1009_v37 }
 0x29f   : > { %v2470_v40 = vpop.eup %2469 }
 0x2a0   : > { %2473 = vpow2.f32 %v1040_v39  ;;  %v1080_v41 = vpack.c.bf16 %v2470_v40, %v2468_v38  ;;  %v2472_v42 = vpop.eup %2471 }
 0x2a1   : > { %v1056_v43 = vadd.f32 1.0, %v2472_v42  ;;  %v2104_v42 = vld [vmem:[#allocation8 + $0x60] sm:$0xf] }
 0x2a2   : > { %1186 = vmatmul.bf16.gmra.mxu0 %v1080_v41 }
 0x2a3   : > { %2475 = vrcp.f32 %v1056_v43  ;;  %v2187_v43 = vld [vmem:[#allocation8 + $0x64] sm:$0xf0] }
 0x2a6   : > { %v2474_v44 = vpop.eup %2473 }
 0x2a7   : > { %v1057_v46 = vadd.f32 1.0, %v2474_v44  ;;  %v2186_v44 = vld [vmem:[#allocation8 + $0x64] sm:$0xf] }
 0x2a9   : > { %2477 = vrcp.f32 %v1057_v46  ;;  %v2476_v47 = vpop.eup %2475 }
 0x2af   : > { %v2478_v48 = vpop.eup %2477 }
 0x2b0   : > { %v1081_v50 = vpack.c.bf16 %v2478_v48, %v2476_v47  ;;  %v2105_v47 = vor.u32 %v2187_v43, %v2104_v42  ;;  %v2106_v48 = vld [vmem:[#allocation8 + $0x68] sm:$0xf0]  ;;  %v2080_v43 = vld [vmem:[#allocation8 + $0x30] sm:$0xf] }
 0x2b1   : > { %v2109_v45 = vor.u32 %v2186_v44, %v2106_v48  ;;  %v2181_v44 = vld [vmem:[#allocation8 + $0x34] sm:$0xf0] }
 0x2b2   : > { %1191 = vmatmul.bf16.gmra.mxu0 %v1081_v50  ;;  %1587 = vmatpush.bf16.msrb.mxu2 %v2105_v47  ;;  %v2081_v48 = vor.u32 %v2181_v44, %v2080_v43 }
 0x2b3   : > { %1636 = vmatpush.bf16.msrb.mxu3 %v2109_v45  ;;  %v2082_v45 = vld [vmem:[#allocation8 + $0x38] sm:$0xf0] }
 0x2bf   : > { %v1157_v53 = vpop.f32.mrf.mxu0 }
 0x2c0   : > { %v1158_v54 = vadd.f32 %v1157_v53, %v3104_v52 }
 0x2c2   : > { %v1197_v55 = vsub.f32 0.0, %v1158_v54 }
 0x2c4   : > { %v1213_v56 = vmul.f32 1.442695, %v1197_v55 }
 0x2c6   : > { %2479 = vpow2.f32 %v1213_v56 }
 0x2c7   : > { %v1159_v57 = vpop.f32.mrf.mxu0 }
 0x2c8   : > { %v1160_v58 = vadd.f32 %v1159_v57, %v3104_v52 }
 0x2ca   : > { %v1198_v59 = vsub.f32 0.0, %v1160_v58 }
 0x2cc   : > { %v1215_v60 = vmul.f32 1.442695, %v1198_v59  ;;  %v2480_v61 = vpop.eup %2479 }
 0x2cd   : > { %v1245_v63 = vadd.f32 1.0, %v2480_v61 }
 0x2ce   : > { %2481 = vpow2.f32 %v1215_v60 }
 0x2cf   : > { %v1162_v6 = vpop.f32.mrf.mxu0  ;;  %2483 = vrcp.f32 %v1245_v63 }
 0x2d0   : > { %v1163_v62 = vadd.f32 %v1162_v6, %v3104_v52 }
 0x2d2   : > { %v1199_v0 = vsub.f32 0.0, %v1163_v62 }
 0x2d4   : > { %v2482_v1 = vpop.eup %2481  ;;  %v1217_v3 = vmul.f32 1.442695, %v1199_v0  ;;  %v2096_v0 = vld [vmem:[#allocation8 + $0x50] sm:$0xf] }
 0x2d5   : > { %v1246_v2 = vadd.f32 1.0, %v2482_v1  ;;  %v2484_v9 = vpop.eup %2483  ;;  %v2185_v1 = vld [vmem:[#allocation8 + $0x54] sm:$0xf0] }
 0x2d7   : > { %2485 = vrcp.f32 %v1246_v2  ;;  %v1164_v4 = vpop.f32.mrf.mxu0  ;;  %v2184_v2 = vld [vmem:[#allocation8 + $0x54] sm:$0xf] }
 0x2d8   : > { %v1165_v5 = vadd.f32 %v1164_v4, %v3104_v52  ;;  %2487 = vpow2.f32 %v1217_v3  ;;  %v2097_v4 = vor.u32 %v2185_v1, %v2096_v0 }
 0x2da   : > { %v1200_v7 = vsub.f32 0.0, %v1165_v5  ;;  %v2098_v5 = vld [vmem:[#allocation8 + $0x58] sm:$0xf0]  ;;  %1588 = vmatpush.bf16.msrb.mxu2 %v2097_v4 }
 0x2dc   : > { %v1219_v10 = vmul.f32 1.442695, %v1200_v7  ;;  %v2101_v7 = vor.u32 %v2184_v2, %v2098_v5 }
 0x2dd   : > { %v2486_v11 = vpop.eup %2485 }
 0x2de   : > { %2489 = vpow2.f32 %v1219_v10  ;;  %v1277_v12 = vpack.c.bf16 %v2486_v11, %v2484_v9  ;;  %v2488_v13 = vpop.eup %2487  ;;  %1637 = vmatpush.bf16.msrb.mxu3 %v2101_v7  ;;  %1589 = vmatpush.bf16.msrb.mxu2 %v2089_v27  ;;  %v2056_v27 = vld [vmem:[#allocation8] sm:$0xf] }
 0x2df   : > { %v1167_v14 = vpop.f32.mrf.mxu0  ;;  %v1247_v16 = vadd.f32 1.0, %v2488_v13 }
 0x2e0   : > { %v1168_v15 = vadd.f32 %v1167_v14, %v3104_v52  ;;  %1359 = vmatmul.bf16.vlgmr.msrb.gmra.mxu1 %v1277_v12 }
 0x2e1   : > { %2491 = vrcp.f32 %v1247_v16 }
 0x2e2   : > { %v1201_v17 = vsub.f32 0.0, %v1168_v15  ;;  %1590 = vmatpush.bf16.msrb.mxu2 %v2081_v48 }
 0x2e4   : > { %v2490_v18 = vpop.eup %2489  ;;  %v1221_v20 = vmul.f32 1.442695, %v1201_v17 }
 0x2e5   : > { %v1248_v19 = vadd.f32 1.0, %v2490_v18 }
 0x2e7   : > { %2493 = vrcp.f32 %v1248_v19  ;;  %v1169_v21 = vpop.f32.mrf.mxu0  ;;  %v2492_v30 = vpop.eup %2491 }
 0x2e8   : > { %v1170_v25 = vadd.f32 %v1169_v21, %v3104_v52  ;;  %2495 = vpow2.f32 %v1221_v20 }
 0x2ea   : > { %v1202_v29 = vsub.f32 0.0, %v1170_v25  ;;  %v2182_v25 = vld [vmem:[#allocation8 + $0x44] sm:$0xf] }
 0x2ec   : > { %v1223_v31 = vmul.f32 1.442695, %v1202_v29  ;;  %v2093_v29 = vor.u32 %v2182_v25, %v2090_v28  ;;  %v2066_v25 = vld [vmem:[#allocation8 + $0x18] sm:$0xf0]  ;;  %v2175_v28 = vld [vmem:[#allocation8 + $0x4] sm:$0xf0] }
 0x2ed   : > { %v2494_v32 = vpop.eup %2493 }
 0x2ee   : > { %2497 = vpow2.f32 %v1223_v31  ;;  %v1278_v33 = vpack.c.bf16 %v2494_v32, %v2492_v30  ;;  %v2496_v34 = vpop.eup %2495  ;;  %1638 = vmatpush.bf16.msrb.mxu3 %v2093_v29  ;;  %v2174_v29 = vld [vmem:[#allocation8 + $0x4] sm:$0xf] }
 0x2ef   : > { %v1172_v35 = vpop.f32.mrf.mxu0  ;;  %v1249_v36 = vadd.f32 1.0, %v2496_v34 }
 0x2f0   : > { %v1173_v8 = vadd.f32 %v1172_v35, %v3104_v52  ;;  %1364 = vmatmul.bf16.gmra.mxu1 %v1278_v33 }
 0x2f1   : > { %2499 = vrcp.f32 %v1249_v36 }
 0x2f2   : > { %v1203_v37 = vsub.f32 0.0, %v1173_v8 }
 0x2f4   : > { %v2498_v38 = vpop.eup %2497  ;;  %v1225_v40 = vmul.f32 1.442695, %v1203_v37 }
 0x2f5   : > { %v1250_v39 = vadd.f32 1.0, %v2498_v38 }
 0x2f7   : > { %2501 = vrcp.f32 %v1250_v39  ;;  %v1174_v41 = vpop.f32.mrf.mxu0  ;;  %v2500_v49 = vpop.eup %2499 }
 0x2f8   : > { %v1175_v46 = vadd.f32 %v1174_v41, %v3104_v52  ;;  %2503 = vpow2.f32 %v1225_v40 }
 0x2fa   : > { %v1204_v50 = vsub.f32 0.0, %v1175_v46  ;;  %v2180_v46 = vld [vmem:[#allocation8 + $0x34] sm:$0xf] }
 0x2fc   : > { %v1227_v53 = vmul.f32 1.442695, %v1204_v50  ;;  %v2072_v50 = vld [vmem:[#allocation8 + $0x20] sm:$0xf] }
 0x2fd   : > { %v2502_v54 = vpop.eup %2501 }
 0x2fe   : > { %2505 = vpow2.f32 %v1227_v53  ;;  %v1279_v55 = vpack.c.bf16 %v2502_v54, %v2500_v49  ;;  %v2504_v56 = vpop.eup %2503  ;;  %v2179_v49 = vld [vmem:[#allocation8 + $0x24] sm:$0xf0]  ;;  %v2085_v53 = vor.u32 %v2180_v46, %v2082_v45  ;;  %v2178_v54 = vld [vmem:[#allocation8 + $0x24] sm:$0xf] }
 0x2ff   : > { %v1177_v57 = vpop.f32.mrf.mxu0  ;;  %v1251_v59 = vadd.f32 1.0, %v2504_v56 }
 0x300   : > { %v1178_v58 = vadd.f32 %v1177_v57, %v3104_v52  ;;  %1369 = vmatmul.bf16.gmra.mxu1 %v1279_v55  ;;  %v2074_v55 = vld [vmem:[#allocation8 + $0x28] sm:$0xf0]  ;;  %v2073_v57 = vor.u32 %v2179_v49, %v2072_v50  ;;  %1639 = vmatpush.bf16.msrb.mxu3 %v2085_v53 }
 0x301   : > { %2507 = vrcp.f32 %v1251_v59 }
 0x302   : > { %v1205_v60 = vsub.f32 0.0, %v1178_v58  ;;  %v2077_v58 = vor.u32 %v2178_v54, %v2074_v55  ;;  %1591 = vmatpush.bf16.msrb.mxu2 %v2073_v57 }
 0x304   : > { %v2506_v61 = vpop.eup %2505  ;;  %v1229_v62 = vmul.f32 1.442695, %v1205_v60  ;;  %1640 = vmatpush.bf16.msrb.mxu3 %v2077_v58 }
 0x305   : > { %v1252_v6 = vadd.f32 1.0, %v2506_v61 }
 0x307   : > { %2509 = vrcp.f32 %v1252_v6  ;;  %v1179_v63 = vpop.f32.mrf.mxu0  ;;  %v2508_v10 = vpop.eup %2507 }
 0x308   : > { %v1180_v3 = vadd.f32 %v1179_v63, %v3104_v52  ;;  %2511 = vpow2.f32 %v1229_v62 }
 0x30a   : > { %v1206_v9 = vsub.f32 0.0, %v1180_v3 }
 0x30c   : > { %v1231_v11 = vmul.f32 1.442695, %v1206_v9 }
 0x30d   : > { %v2510_v12 = vpop.eup %2509 }
 0x30e   : > { %2513 = vpow2.f32 %v1231_v11  ;;  %v1280_v13 = vpack.c.bf16 %v2510_v12, %v2508_v10  ;;  %v2512_v14 = vpop.eup %2511 }
 0x30f   : > { %v1182_v15 = vpop.f32.mrf.mxu0  ;;  %v1253_v17 = vadd.f32 1.0, %v2512_v14 }
 0x310   : > { %v1183_v16 = vadd.f32 %v1182_v15, %v3104_v52  ;;  %1374 = vmatmul.bf16.gmra.mxu1 %v1280_v13 }
 0x311   : > { %2515 = vrcp.f32 %v1253_v17 }
 0x312   : > { %v1207_v18 = vsub.f32 0.0, %v1183_v16 }
 0x314   : > { %v2514_v19 = vpop.eup %2513  ;;  %v1233_v21 = vmul.f32 1.442695, %v1207_v18 }
 0x315   : > { %v1254_v20 = vadd.f32 1.0, %v2514_v19 }
 0x317   : > { %2517 = vrcp.f32 %v1254_v20  ;;  %v1184_v22 = vpop.f32.mrf.mxu0  ;;  %v2516_v31 = vpop.eup %2515 }
 0x318   : > { %v1185_v26 = vadd.f32 %v1184_v22, %v3104_v52  ;;  %2519 = vpow2.f32 %v1233_v21  ;;  %v2064_v21 = vld [vmem:[#allocation8 + $0x10] sm:$0xf]  ;;  %v2177_v22 = vld [vmem:[#allocation8 + $0x14] sm:$0xf0] }
 0x319   : > { %v2065_v24 = vor.u32 %v2177_v22, %v2064_v21 }
 0x31a   : > { %v1208_v30 = vsub.f32 0.0, %v1185_v26  ;;  %v2069_v26 = vor.u32 %v2176_v23, %v2066_v25 }
 0x31b   : > { %1592 = vmatpush.bf16.msrb.mxu2 %v2065_v24 }
 0x31c   : > { %v1235_v32 = vmul.f32 1.442695, %v1208_v30  ;;  %1641 = vmatpush.bf16.msrb.mxu3 %v2069_v26  ;;  %v2057_v30 = vor.u32 %v2175_v28, %v2056_v27 }
 0x31d   : > { %v2518_v33 = vpop.eup %2517 }
 0x31e   : > { %2521 = vpow2.f32 %v1235_v32  ;;  %v1281_v34 = vpack.c.bf16 %v2518_v33, %v2516_v31  ;;  %v2520_v35 = vpop.eup %2519  ;;  %v2058_v31 = vld [vmem:[#allocation8 + $0x8] sm:$0xf0]  ;;  %v3123_v32 = vperm.slane %v3101_v51, 4 }
 0x31f   : > { %v1187_v8 = vpop.f32.mrf.mxu0  ;;  %v1255_v37 = vadd.f32 1.0, %v2520_v35  ;;  %v2061_v33 = vor.u32 %v2174_v29, %v2058_v31  ;;  %1593 = vmatpush.bf16.msrb.mxu2 %v2057_v30 }
 0x320   : > { %v1188_v36 = vadd.f32 %v1187_v8, %v3104_v52  ;;  %1379 = vmatmul.bf16.gmra.mxu1 %v1281_v34 }
 0x321   : > { %2523 = vrcp.f32 %v1255_v37  ;;  %1642 = vmatpush.bf16.msrb.mxu3 %v2061_v33 }
 0x322   : > { %v1209_v38 = vsub.f32 0.0, %v1188_v36 }
 0x324   : > { %v2522_v39 = vpop.eup %2521  ;;  %v1237_v41 = vmul.f32 1.442695, %v1209_v38 }
 0x325   : > { %v1256_v40 = vadd.f32 1.0, %v2522_v39 }
 0x327   : > { %2525 = vrcp.f32 %v1256_v40  ;;  %v1189_v42 = vpop.f32.mrf.mxu0  ;;  %v2524_v59 = vpop.eup %2523 }
 0x328   : > { %v1190_v47 = vadd.f32 %v1189_v42, %v3104_v52  ;;  %2527 = vpow2.f32 %v1237_v41 }
 0x32a   : > { %v1210_v56 = vsub.f32 0.0, %v1190_v47 }
 0x32c   : > { %v1239_v60 = vmul.f32 1.442695, %v1210_v56 }
 0x32d   : > { %v2526_v61 = vpop.eup %2525 }
 0x32e   : > { %2529 = vpow2.f32 %v1239_v60  ;;  %v1282_v6 = vpack.c.bf16 %v2526_v61, %v2524_v59  ;;  %v2528_v62 = vpop.eup %2527 }
 0x32f   : > { %v1192_v63 = vpop.f32.mrf.mxu0  ;;  %v1257_v1 = vadd.f32 1.0, %v2528_v62 }
 0x330   : > { %v1193_v0 = vadd.f32 %v1192_v63, %v3104_v52  ;;  %1384 = vmatmul.bf16.gmra.mxu1 %v1282_v6 }
 0x331   : > { %2531 = vrcp.f32 %v1257_v1 }
 0x332   : > { %v1211_v2 = vsub.f32 0.0, %v1193_v0 }
 0x334   : > { %v2530_v3 = vpop.eup %2529  ;;  %v1241_v5 = vmul.f32 1.442695, %v1211_v2 }
 0x335   : > { %v1258_v4 = vadd.f32 1.0, %v2530_v3 }
 0x337   : > { %2533 = vrcp.f32 %v1258_v4  ;;  %v1194_v7 = vpop.f32.mrf.mxu0  ;;  %v2532_v11 = vpop.eup %2531 }
 0x338   : > { %v1195_v9 = vadd.f32 %v1194_v7, %v3104_v52  ;;  %2535 = vpow2.f32 %v1241_v5 }
 0x33a   : > { %v1212_v10 = vsub.f32 0.0, %v1195_v9 }
 0x33c   : > { %v1243_v12 = vmul.f32 1.442695, %v1212_v10 }
 0x33d   : > { %v2534_v13 = vpop.eup %2533 }
 0x33e   : > { %2537 = vpow2.f32 %v1243_v12  ;;  %v1283_v14 = vpack.c.bf16 %v2534_v13, %v2532_v11  ;;  %v2536_v15 = vpop.eup %2535 }
 0x33f   : > { %v1259_v16 = vadd.f32 1.0, %v2536_v15 }
 0x340   : > { %1389 = vmatmul.bf16.gmra.mxu1 %v1283_v14 }
 0x341   : > { %2539 = vrcp.f32 %v1259_v16 }
 0x344   : > { %v2538_v17 = vpop.eup %2537 }
 0x345   : > { %v1260_v18 = vadd.f32 1.0, %v2538_v17 }
 0x347   : > { %2541 = vrcp.f32 %v1260_v18  ;;  %v2540_v19 = vpop.eup %2539 }
 0x34d   : > { %v2542_v20 = vpop.eup %2541 }
 0x34e   : > { %v1284_v52 = vpack.c.bf16 %v2542_v20, %v2540_v19 }
 0x350   : > { %1394 = vmatmul.bf16.gmra.mxu1 %v1284_v52 }
 0x35d   : > { %v1360_v34 = vpop.f32.mrf.mxu1 }
 0x35e   : > { %v1361_v35 = vadd.f32 %v1360_v34, %v3123_v32 }
 0x360   : > { %v1400_v8 = vsub.f32 0.0, %v1361_v35 }
 0x362   : > { %v1416_v36 = vmul.f32 1.442695, %v1400_v8 }
 0x364   : > { %2543 = vpow2.f32 %v1416_v36 }
 0x365   : > { %v1362_v37 = vpop.f32.mrf.mxu1 }
 0x366   : > { %v1363_v38 = vadd.f32 %v1362_v37, %v3123_v32 }
 0x368   : > { %v1401_v39 = vsub.f32 0.0, %v1363_v38 }
 0x36a   : > { %v1418_v40 = vmul.f32 1.442695, %v1401_v39  ;;  %v2544_v41 = vpop.eup %2543 }
 0x36b   : > { %v1448_v44 = vadd.f32 1.0, %v2544_v41 }
 0x36c   : > { %2545 = vpow2.f32 %v1418_v40 }
 0x36d   : > { %v1365_v42 = vpop.f32.mrf.mxu1  ;;  %2547 = vrcp.f32 %v1448_v44 }
 0x36e   : > { %v1366_v43 = vadd.f32 %v1365_v42, %v3123_v32 }
 0x370   : > { %v1402_v46 = vsub.f32 0.0, %v1366_v43 }
 0x372   : > { %v2546_v47 = vpop.eup %2545  ;;  %v1420_v45 = vmul.f32 1.442695, %v1402_v46 }
 0x373   : > { %v1449_v48 = vadd.f32 1.0, %v2546_v47  ;;  %v2548_v54 = vpop.eup %2547 }
 0x375   : > { %2549 = vrcp.f32 %v1449_v48  ;;  %v1367_v50 = vpop.f32.mrf.mxu1 }
 0x376   : > { %v1368_v49 = vadd.f32 %v1367_v50, %v3123_v32  ;;  %2551 = vpow2.f32 %v1420_v45 }
 0x378   : > { %v1403_v53 = vsub.f32 0.0, %v1368_v49 }
 0x37a   : > { %v1422_v55 = vmul.f32 1.442695, %v1403_v53 }
 0x37b   : > { %v2550_v56 = vpop.eup %2549 }
 0x37c   : > { %2553 = vpow2.f32 %v1422_v55  ;;  %v1480_v57 = vpack.c.bf16 %v2550_v56, %v2548_v54  ;;  %v2552_v58 = vpop.eup %2551 }
 0x37d   : > { %v1370_v59 = vpop.f32.mrf.mxu1  ;;  %v1450_v61 = vadd.f32 1.0, %v2552_v58 }
 0x37e   : > { %v1371_v60 = vadd.f32 %v1370_v59, %v3123_v32  ;;  %1594 = vmatmul.bf16.vlgmr.msrb.gmra.mxu2 %v1480_v57  ;;  %1643 = vmatmul.bf16.vlgmr.msrb.gmra.mxu3 %v1480_v57 }
 0x37f   : > { %2555 = vrcp.f32 %v1450_v61 }
 0x380   : > { %v1404_v6 = vsub.f32 0.0, %v1371_v60 }
 0x382   : > { %v2554_v62 = vpop.eup %2553  ;;  %v1424_v0 = vmul.f32 1.442695, %v1404_v6 }
 0x383   : > { %v1451_v63 = vadd.f32 1.0, %v2554_v62 }
 0x385   : > { %2557 = vrcp.f32 %v1451_v63  ;;  %v1372_v1 = vpop.f32.mrf.mxu1  ;;  %v2556_v4 = vpop.eup %2555 }
 0x386   : > { %v1373_v2 = vadd.f32 %v1372_v1, %v3123_v32  ;;  %2559 = vpow2.f32 %v1424_v0 }
 0x388   : > { %v1405_v3 = vsub.f32 0.0, %v1373_v2 }
 0x38a   : > { %v1426_v5 = vmul.f32 1.442695, %v1405_v3 }
 0x38b   : > { %v2558_v7 = vpop.eup %2557 }
 0x38c   : > { %2561 = vpow2.f32 %v1426_v5  ;;  %v1481_v9 = vpack.c.bf16 %v2558_v7, %v2556_v4  ;;  %v2560_v10 = vpop.eup %2559 }
 0x38d   : > { %v1375_v11 = vpop.f32.mrf.mxu1  ;;  %v1452_v13 = vadd.f32 1.0, %v2560_v10 }
 0x38e   : > { %v1376_v12 = vadd.f32 %v1375_v11, %v3123_v32  ;;  %1599 = vmatmul.bf16.gmra.mxu2 %v1481_v9  ;;  %1648 = vmatmul.bf16.gmra.mxu3 %v1481_v9 }
 0x38f   : > { %2563 = vrcp.f32 %v1452_v13 }
 0x390   : > { %v1406_v14 = vsub.f32 0.0, %v1376_v12 }
 0x392   : > { %v2562_v15 = vpop.eup %2561  ;;  %v1428_v17 = vmul.f32 1.442695, %v1406_v14 }
 0x393   : > { %v1453_v16 = vadd.f32 1.0, %v2562_v15 }
 0x395   : > { %2565 = vrcp.f32 %v1453_v16  ;;  %v1377_v18 = vpop.f32.mrf.mxu1  ;;  %v2564_v21 = vpop.eup %2563 }
 0x396   : > { %v1378_v19 = vadd.f32 %v1377_v18, %v3123_v32  ;;  %2567 = vpow2.f32 %v1428_v17 }
 0x398   : > { %v1407_v20 = vsub.f32 0.0, %v1378_v19 }
 0x39a   : > { %v1430_v22 = vmul.f32 1.442695, %v1407_v20 }
 0x39b   : > { %v2566_v23 = vpop.eup %2565 }
 0x39c   : > { %2569 = vpow2.f32 %v1430_v22  ;;  %v1482_v52 = vpack.c.bf16 %v2566_v23, %v2564_v21  ;;  %v2568_v24 = vpop.eup %2567 }
 0x39d   : > { %v1380_v25 = vpop.f32.mrf.mxu1  ;;  %v1454_v27 = vadd.f32 1.0, %v2568_v24 }
 0x39e   : > { %v1381_v26 = vadd.f32 %v1380_v25, %v3123_v32  ;;  %1604 = vmatmul.bf16.gmra.mxu2 %v1482_v52  ;;  %1653 = vmatmul.bf16.gmra.mxu3 %v1482_v52 }
 0x39f   : > { %2571 = vrcp.f32 %v1454_v27 }
 0x3a0   : > { %v1408_v28 = vsub.f32 0.0, %v1381_v26 }
 0x3a2   : > { %v2570_v29 = vpop.eup %2569  ;;  %v1432_v31 = vmul.f32 1.442695, %v1408_v28 }
 0x3a3   : > { %v1455_v30 = vadd.f32 1.0, %v2570_v29  ;;  %v3142_v29 = vperm.slane %v3101_v51, 5 }
 0x3a5   : > { %2573 = vrcp.f32 %v1455_v30  ;;  %v1382_v33 = vpop.f32.mrf.mxu1  ;;  %v2572_v8 = vpop.eup %2571 }
 0x3a6   : > { %v1383_v34 = vadd.f32 %v1382_v33, %v3123_v32  ;;  %2575 = vpow2.f32 %v1432_v31 }
 0x3a8   : > { %v1409_v35 = vsub.f32 0.0, %v1383_v34 }
 0x3aa   : > { %v1434_v36 = vmul.f32 1.442695, %v1409_v35 }
 0x3ab   : > { %v2574_v37 = vpop.eup %2573 }
 0x3ac   : > { %2577 = vpow2.f32 %v1434_v36  ;;  %v1483_v38 = vpack.c.bf16 %v2574_v37, %v2572_v8  ;;  %v2576_v39 = vpop.eup %2575 }
 0x3ad   : > { %v1385_v40 = vpop.f32.mrf.mxu1  ;;  %v1456_v42 = vadd.f32 1.0, %v2576_v39 }
 0x3ae   : > { %v1386_v41 = vadd.f32 %v1385_v40, %v3123_v32  ;;  %1609 = vmatmul.bf16.gmra.mxu2 %v1483_v38  ;;  %1658 = vmatmul.bf16.gmra.mxu3 %v1483_v38 }
 0x3af   : > { %2579 = vrcp.f32 %v1456_v42 }
 0x3b0   : > { %v1410_v43 = vsub.f32 0.0, %v1386_v41 }
 0x3b2   : > { %v2578_v44 = vpop.eup %2577  ;;  %v1436_v47 = vmul.f32 1.442695, %v1410_v43 }
 0x3b3   : > { %v1457_v46 = vadd.f32 1.0, %v2578_v44 }
 0x3b5   : > { %2581 = vrcp.f32 %v1457_v46  ;;  %v1387_v48 = vpop.f32.mrf.mxu1  ;;  %v2580_v49 = vpop.eup %2579 }
 0x3b6   : > { %v1388_v45 = vadd.f32 %v1387_v48, %v3123_v32  ;;  %2583 = vpow2.f32 %v1436_v47 }
 0x3b8   : > { %v1411_v50 = vsub.f32 0.0, %v1388_v45 }
 0x3ba   : > { %v1438_v53 = vmul.f32 1.442695, %v1411_v50 }
 0x3bb   : > { %v2582_v54 = vpop.eup %2581 }
 0x3bc   : > { %2585 = vpow2.f32 %v1438_v53  ;;  %v1484_v55 = vpack.c.bf16 %v2582_v54, %v2580_v49  ;;  %v2584_v56 = vpop.eup %2583 }
 0x3bd   : > { %v1390_v57 = vpop.f32.mrf.mxu1  ;;  %v1458_v59 = vadd.f32 1.0, %v2584_v56 }
 0x3be   : > { %v1391_v58 = vadd.f32 %v1390_v57, %v3123_v32  ;;  %1614 = vmatmul.bf16.gmra.mxu2 %v1484_v55  ;;  %1663 = vmatmul.bf16.gmra.mxu3 %v1484_v55 }
 0x3bf   : > { %2587 = vrcp.f32 %v1458_v59 }
 0x3c0   : > { %v1412_v60 = vsub.f32 0.0, %v1391_v58 }
 0x3c2   : > { %v2586_v61 = vpop.eup %2585  ;;  %v1440_v62 = vmul.f32 1.442695, %v1412_v60 }
 0x3c3   : > { %v1459_v6 = vadd.f32 1.0, %v2586_v61 }
 0x3c5   : > { %2589 = vrcp.f32 %v1459_v6  ;;  %v1392_v63 = vpop.f32.mrf.mxu1  ;;  %v2588_v2 = vpop.eup %2587 }
 0x3c6   : > { %v1393_v0 = vadd.f32 %v1392_v63, %v3123_v32  ;;  %2591 = vpow2.f32 %v1440_v62 }
 0x3c8   : > { %v1413_v1 = vsub.f32 0.0, %v1393_v0 }
 0x3ca   : > { %v1442_v3 = vmul.f32 1.442695, %v1413_v1 }
 0x3cb   : > { %v2590_v4 = vpop.eup %2589 }
 0x3cc   : > { %2593 = vpow2.f32 %v1442_v3  ;;  %v1485_v5 = vpack.c.bf16 %v2590_v4, %v2588_v2  ;;  %v2592_v7 = vpop.eup %2591 }
 0x3cd   : > { %v1395_v9 = vpop.f32.mrf.mxu1  ;;  %v1460_v11 = vadd.f32 1.0, %v2592_v7 }
 0x3ce   : > { %v1396_v10 = vadd.f32 %v1395_v9, %v3123_v32  ;;  %1619 = vmatmul.bf16.gmra.mxu2 %v1485_v5  ;;  %1668 = vmatmul.bf16.gmra.mxu3 %v1485_v5 }
 0x3cf   : > { %2595 = vrcp.f32 %v1460_v11 }
 0x3d0   : > { %v1414_v12 = vsub.f32 0.0, %v1396_v10 }
 0x3d2   : > { %v2594_v13 = vpop.eup %2593  ;;  %v1444_v15 = vmul.f32 1.442695, %v1414_v12 }
 0x3d3   : > { %v1461_v14 = vadd.f32 1.0, %v2594_v13 }
 0x3d5   : > { %2597 = vrcp.f32 %v1461_v14  ;;  %v1397_v16 = vpop.f32.mrf.mxu1  ;;  %v2596_v19 = vpop.eup %2595 }
 0x3d6   : > { %v1398_v17 = vadd.f32 %v1397_v16, %v3123_v32  ;;  %2599 = vpow2.f32 %v1444_v15  ;;  %v313_v32 = vld [vmem:[#allocation10 + $0x8] sm:$0xff] }
 0x3d7   : > { %v3144_v30 = vperm.slane %v313_v32, 5 }
 0x3d8   : > { %v1415_v18 = vsub.f32 0.0, %v1398_v17 }
 0x3da   : > { %v1446_v20 = vmul.f32 1.442695, %v1415_v18 }
 0x3db   : > { %v2598_v21 = vpop.eup %2597 }
 0x3dc   : > { %2601 = vpow2.f32 %v1446_v20  ;;  %v1486_v22 = vpack.c.bf16 %v2598_v21, %v2596_v19  ;;  %v2600_v23 = vpop.eup %2599 }
 0x3dd   : > { %v1462_v52 = vadd.f32 1.0, %v2600_v23 }
 0x3de   : > { %1624 = vmatmul.bf16.gmra.mxu2 %v1486_v22  ;;  %1673 = vmatmul.bf16.gmra.mxu3 %v1486_v22 }
 0x3df   : > { %2603 = vrcp.f32 %v1462_v52 }
 0x3e2   : > { %v2602_v24 = vpop.eup %2601 }
 0x3e3   : > { %v1463_v25 = vadd.f32 1.0, %v2602_v24 }
 0x3e5   : > { %2605 = vrcp.f32 %v1463_v25  ;;  %v2604_v26 = vpop.eup %2603 }
 0x3eb   : > { %v2606_v27 = vpop.eup %2605 }
 0x3ec   : > { %v1487_v28 = vpack.c.bf16 %v2606_v27, %v2604_v26 }
 0x3ee   : > { %1629 = vmatmul.bf16.gmra.mxu2 %v1487_v28  ;;  %1678 = vmatmul.bf16.gmra.mxu3 %v1487_v28 }
 0x401   : > { %v1595_v31 = vpop.f32.mrf.mxu2  ;;  %v1644_v33 = vpop.f32.mrf.mxu3 }
 0x402   : > { %v1596_v34 = vadd.f32 %v1595_v31, %v3142_v29  ;;  %v1645_v35 = vadd.f32 %v1644_v33, %v3144_v30 }
 0x404   : > { %1684 = vst [vmem:[%s3150_s24] sm:$0xff] %v1596_v34 }
 0x405   : > { %1685 = vst [vmem:[%s3150_s24 + $0x8] sm:$0xff] %v1645_v35 }
 0x409   : > { %v1597_v51 = vpop.f32.mrf.mxu2  ;;  %v1646_v8 = vpop.f32.mrf.mxu3 }
 0x40a   : > { %v1598_v36 = vadd.f32 %v1597_v51, %v3142_v29  ;;  %v1647_v37 = vadd.f32 %v1646_v8, %v3144_v30 }
 0x40c   : > { %1686 = vst [vmem:[%s3150_s24 + $0x10] sm:$0xff] %v1598_v36 }
 0x40d   : > { %1687 = vst [vmem:[%s3150_s24 + $0x18] sm:$0xff] %v1647_v37 }
 0x411   : > { %v1600_v38 = vpop.f32.mrf.mxu2  ;;  %v1649_v39 = vpop.f32.mrf.mxu3 }
 0x412   : > { %v1601_v40 = vadd.f32 %v1600_v38, %v3142_v29  ;;  %v1650_v41 = vadd.f32 %v1649_v39, %v3144_v30 }
 0x414   : > { %1688 = vst [vmem:[%s3150_s24 + $0x20] sm:$0xff] %v1601_v40 }
 0x415   : > { %1689 = vst [vmem:[%s3150_s24 + $0x28] sm:$0xff] %v1650_v41 }
 0x419   : > { %v1602_v42 = vpop.f32.mrf.mxu2  ;;  %v1651_v43 = vpop.f32.mrf.mxu3 }
 0x41a   : > { %v1603_v44 = vadd.f32 %v1602_v42, %v3142_v29  ;;  %v1652_v46 = vadd.f32 %v1651_v43, %v3144_v30 }
 0x41c   : > { %1690 = vst [vmem:[%s3150_s24 + $0x30] sm:$0xff] %v1603_v44 }
 0x41d   : > { %1691 = vst [vmem:[%s3150_s24 + $0x38] sm:$0xff] %v1652_v46 }
 0x421   : > { %v1605_v47 = vpop.f32.mrf.mxu2  ;;  %v1654_v48 = vpop.f32.mrf.mxu3 }
 0x422   : > { %v1606_v45 = vadd.f32 %v1605_v47, %v3142_v29  ;;  %v1655_v50 = vadd.f32 %v1654_v48, %v3144_v30 }
 0x424   : > { %1692 = vst [vmem:[%s3150_s24 + $0x40] sm:$0xff] %v1606_v45 }
 0x425   : > { %1693 = vst [vmem:[%s3150_s24 + $0x48] sm:$0xff] %v1655_v50 }
 0x429   : > { %v1607_v49 = vpop.f32.mrf.mxu2  ;;  %v1656_v53 = vpop.f32.mrf.mxu3 }
 0x42a   : > { %v1608_v54 = vadd.f32 %v1607_v49, %v3142_v29  ;;  %v1657_v55 = vadd.f32 %v1656_v53, %v3144_v30 }
 0x42c   : > { %1694 = vst [vmem:[%s3150_s24 + $0x50] sm:$0xff] %v1608_v54 }
 0x42d   : > { %1695 = vst [vmem:[%s3150_s24 + $0x58] sm:$0xff] %v1657_v55 }
 0x431   : > { %v1610_v56 = vpop.f32.mrf.mxu2  ;;  %v1659_v57 = vpop.f32.mrf.mxu3 }
 0x432   : > { %v1611_v58 = vadd.f32 %v1610_v56, %v3142_v29  ;;  %v1660_v59 = vadd.f32 %v1659_v57, %v3144_v30 }
 0x434   : > { %1696 = vst [vmem:[%s3150_s24 + $0x60] sm:$0xff] %v1611_v58 }
 0x435   : > { %1697 = vst [vmem:[%s3150_s24 + $0x68] sm:$0xff] %v1660_v59 }
 0x439   : > { %v1612_v60 = vpop.f32.mrf.mxu2  ;;  %v1661_v61 = vpop.f32.mrf.mxu3 }
 0x43a   : > { %v1613_v6 = vadd.f32 %v1612_v60, %v3142_v29  ;;  %v1662_v62 = vadd.f32 %v1661_v61, %v3144_v30 }
 0x43c   : > { %1698 = vst [vmem:[%s3150_s24 + $0x70] sm:$0xff] %v1613_v6 }
 0x43d   : > { %1699 = vst [vmem:[%s3150_s24 + $0x78] sm:$0xff] %v1662_v62 }
 0x441   : > { %v1615_v63 = vpop.f32.mrf.mxu2  ;;  %v1664_v0 = vpop.f32.mrf.mxu3 }
 0x442   : > { %v1616_v1 = vadd.f32 %v1615_v63, %v3142_v29  ;;  %v1665_v2 = vadd.f32 %v1664_v0, %v3144_v30 }
 0x444   : > { %1700 = vst [vmem:[%s3150_s24 + $0x80] sm:$0xff] %v1616_v1 }
 0x445   : > { %1701 = vst [vmem:[%s3150_s24 + $0x88] sm:$0xff] %v1665_v2 }
 0x449   : > { %v1617_v3 = vpop.f32.mrf.mxu2  ;;  %v1666_v4 = vpop.f32.mrf.mxu3 }
 0x44a   : > { %v1618_v5 = vadd.f32 %v1617_v3, %v3142_v29  ;;  %v1667_v7 = vadd.f32 %v1666_v4, %v3144_v30 }
 0x44c   : > { %1702 = vst [vmem:[%s3150_s24 + $0x90] sm:$0xff] %v1618_v5 }
 0x44d   : > { %1703 = vst [vmem:[%s3150_s24 + $0x98] sm:$0xff] %v1667_v7 }
 0x451   : > { %v1620_v9 = vpop.f32.mrf.mxu2  ;;  %v1669_v10 = vpop.f32.mrf.mxu3 }
 0x452   : > { %v1621_v11 = vadd.f32 %v1620_v9, %v3142_v29  ;;  %v1670_v12 = vadd.f32 %v1669_v10, %v3144_v30 }
 0x454   : > { %1704 = vst [vmem:[%s3150_s24 + $0xa0] sm:$0xff] %v1621_v11 }
 0x455   : > { %1705 = vst [vmem:[%s3150_s24 + $0xa8] sm:$0xff] %v1670_v12 }
 0x459   : > { %v1622_v13 = vpop.f32.mrf.mxu2  ;;  %v1671_v14 = vpop.f32.mrf.mxu3 }
 0x45a   : > { %v1623_v15 = vadd.f32 %v1622_v13, %v3142_v29  ;;  %v1672_v16 = vadd.f32 %v1671_v14, %v3144_v30 }
 0x45c   : > { %1706 = vst [vmem:[%s3150_s24 + $0xb0] sm:$0xff] %v1623_v15 }
 0x45d   : > { %1707 = vst [vmem:[%s3150_s24 + $0xb8] sm:$0xff] %v1672_v16 }
 0x461   : > { %v1625_v17 = vpop.f32.mrf.mxu2  ;;  %v1674_v18 = vpop.f32.mrf.mxu3 }
 0x462   : > { %v1626_v19 = vadd.f32 %v1625_v17, %v3142_v29  ;;  %v1675_v20 = vadd.f32 %v1674_v18, %v3144_v30 }
 0x464   : > { %1708 = vst [vmem:[%s3150_s24 + $0xc0] sm:$0xff] %v1626_v19 }
 0x465   : > { %1709 = vst [vmem:[%s3150_s24 + $0xc8] sm:$0xff] %v1675_v20 }
 0x469   : > { %v1627_v21 = vpop.f32.mrf.mxu2  ;;  %v1676_v22 = vpop.f32.mrf.mxu3 }
 0x46a   : > { %v1628_v23 = vadd.f32 %v1627_v21, %v3142_v29  ;;  %v1677_v52 = vadd.f32 %v1676_v22, %v3144_v30 }
 0x46c   : > { %1710 = vst [vmem:[%s3150_s24 + $0xd0] sm:$0xff] %v1628_v23 }
 0x46d   : > { %1711 = vst [vmem:[%s3150_s24 + $0xd8] sm:$0xff] %v1677_v52 }
 0x471   : > { %v1630_v24 = vpop.f32.mrf.mxu2  ;;  %v1679_v25 = vpop.f32.mrf.mxu3 }
 0x472   : > { %v1631_v26 = vadd.f32 %v1630_v24, %v3142_v29  ;;  %v1680_v27 = vadd.f32 %v1679_v25, %v3144_v30 }
 0x474   : > { %1712 = vst [vmem:[%s3150_s24 + $0xe0] sm:$0xff] %v1631_v26 }
 0x475   : > { %1713 = vst [vmem:[%s3150_s24 + $0xe8] sm:$0xff] %v1680_v27 }
 0x479   : > { %v1632_v28 = vpop.f32.mrf.mxu2  ;;  %v1681_v32 = vpop.f32.mrf.mxu3 }
 0x47a   : > { %v1633_v31 = vadd.f32 %v1632_v28, %v3142_v29  ;;  %v1682_v33 = vadd.f32 %v1681_v32, %v3144_v30 }
 0x47c   : > { %1714 = vst [vmem:[%s3150_s24 + $0xf0] sm:$0xff] %v1633_v31 }
 0x47d   : > { %1715 = vst [vmem:[%s3150_s24 + $0xf8] sm:$0xff] %v1682_v33 }
 0x47e   : > { %2785 = shalt.err (!%p2782_p10)
}
 0x47f   : > { %s2844_s28 = smov 256   ;;  %s2845_s15 = smov 16  }
 0x480   : > { %2210 = dma.vmem_to_hbm [thread:$0]  (%p2960_p3), %s1731_s9, 4096, %s1733_s7, %s1717_s22, %s2844_s28, %s2844_s28, %s2845_s15  }
 0x481 PF: > { %s1747_s24 = sand.u32 1, %s2820_s18   ;;  %p3260_p12 = scmp.ge.s32.totalorder %s2832_s21, 2 }
 0x482   : > { %s1748_s29 = scalar_lea.sflag [#allocation4], %s1747_s24 }
 0x483   : > { %p2230_p13 = pnand %p3260_p12, %p2911_p6 }
 0x485   : > { %p2231_p0 = pneg %p2230_p13 }
 0x487   : > { %2815 = dma.done.wait (%p2231_p0), %s1748_s29, 4096  }
 0x488   : > { %2817 = vsyncadd (%p2231_p0), %s1748_s29, 4294963200  ;;  %p20_p5 = scmp.ge.s32.totalorder %s2950_s13, 4   ;;  %s3261_s18 = smov %s2824_s19 }
 0x489   : > { %s3262_s19 = smov %s2828_s20  ;;  %s3263_s20 = smov %s2966_s11 }
 0x48a   : > { %s3264_s21 = smov %s2950_s13  ;;  %22 = sbr.rel (!%p20_p5) target bundleno = 7 (0x7), region = 104 }
 0x48f   :  { %1754 = vsyncpa [#allocation3], 1 }
 0x490   :  { %1756 = vsyncpa [#allocation3 + $0x1], 1 }
 0x491   :  { %1757 = vsyncpa [#allocation6], 1 }
 0x492   :  { %1758 = vsyncpa [#allocation9], 1 }
 0x493   :  { %1759 = vsyncpa [#allocation4], 1 }
 0x494   :  { %1761 = vsyncpa [#allocation4 + $0x1], 1 }

</bundles_post_ra>
